<compile_context>
chip_gen: v7x
topology: tpu7x:2x2x1
jax: 0.10.0
libtpu: 0.0.40
codegen_flags: <defaults>
</compile_context>

<pallas_src>
import math
import functools

import jax
import jax.numpy as jnp
from jax.experimental import pallas as pl
from jax.experimental.pallas import tpu as pltpu

EPS = 1e-6
NEG_FILL = -1e9   # reference: masked_fill_(mask == 0, -1e9)


# ------------------------------ helpers ---------------------------------------
def _vmem_limit_bytes():
    """Scoped-VMEM limit keyed off the actual chip, with headroom for compiler
    internal scratch (v5e/v6e: 128 MiB physical, v7x: 64 MiB)."""
    cap = 64 * 1024 * 1024
    try:
        cap = int(pltpu.get_tpu_info().vmem_capacity_bytes)
    except Exception:
        pass
    return max(32 * 1024 * 1024, min(cap - 8 * 1024 * 1024, 96 * 1024 * 1024))


def _compiler_params(n_grid_dims):
    return pltpu.CompilerParams(
        dimension_semantics=("parallel",) * n_grid_dims,
        vmem_limit_bytes=_vmem_limit_bytes(),
    )


def _normalize(x, d):
    """(x - mean) * rsqrt(var), torch-style unbiased var (ddof=1). O(1) output.

    The reference quirk's alpha*beta/eps (= 1e6) scale is applied AFTER the
    following matmul (scalar factor, algebraically exact), so the bf16 MXU
    operands stay O(1) instead of O(1e6).
    (Divides by zero for constant rows / d == 1, exactly like the reference.)"""
    mean = jnp.mean(x, axis=-1, keepdims=True)
    var = jnp.sum((x - mean) ** 2, axis=-1, keepdims=True) * (1.0 / (d - 1))
    return (x - mean) * jax.lax.rsqrt(var)


def _mha(q, k, v, maskz, h, dk):
    """q:(Sq,D) f32 (already 1/sqrt(dk)-scaled), k,v:(Sk,D) f32, maskz:(Sq,Sk) bool.
    Returns a lane-dense (Sq, D) f32 (heads concatenated in-register)."""
    outs = []
    # TODO(synk): for large h, move heads onto a fori_loop / grid axis to bound
    # vreg live ranges; static unroll is fine for small h.
    for hh in range(h):                                # static unroll over heads
        sl = slice(hh * dk, (hh + 1) * dk)
        qh = q[:, sl].astype(jnp.bfloat16)
        kh = k[:, sl].astype(jnp.bfloat16)
        vh = v[:, sl].astype(jnp.bfloat16)
        # contract last dims directly (no explicit transpose)
        s = jax.lax.dot_general(qh, kh, (((1,), (1,)), ((), ())),
                                preferred_element_type=jnp.float32)
        s = jnp.where(maskz, NEG_FILL, s)
        s = s - jnp.max(s, axis=-1, keepdims=True)      # stable softmax
        p = jnp.exp(s)
        p = p * pl.reciprocal(jnp.sum(p, axis=-1, keepdims=True), approx=True)
        outs.append(jnp.dot(p.astype(jnp.bfloat16), vh,
                            preferred_element_type=jnp.float32))
    # TODO(synk): attention-weights dropout omitted (identity / eval mode).
    return jnp.concatenate(outs, axis=-1)               # (Sq, D), lane-dense


# ------------------------ fused decoder-block kernel ---------------------------
def _decoder_block_kernel(
        x_ref, enc_ref, tgt_mask_ref, src_mask_ref,
        w_qkv_ref, b_qkv_ref, wo_s_ref, bo_s_ref,
        w_q_ref, b_q_ref, w_kv_ref, b_kv_ref, wo_c_ref, bo_c_ref,
        w1_ref, b1_ref, w2_ref, b2_ref,
        o_ref, *, h, dk, d, ln_scale):
    x = x_ref[...]                                      # (Sq, D) f32 residual stream

    # -------- residual_connection[0]: self-attention sublayer --------
    nx = _normalize(x, d).astype(jnp.bfloat16)
    qkv = ln_scale * jnp.dot(nx, w_qkv_ref[...],
                             preferred_element_type=jnp.float32) + b_qkv_ref[...]
    q, k, v = qkv[:, :d], qkv[:, d:2 * d], qkv[:, 2 * d:]
    maskz = tgt_mask_ref[...].astype(jnp.float32) == 0.0
    attn = _mha(q, k, v, maskz, h, dk)
    x = x + (jnp.dot(attn.astype(jnp.bfloat16), wo_s_ref[...],
                     preferred_element_type=jnp.float32) + bo_s_ref[...])

    # -------- residual_connection[1]: cross-attention sublayer --------
    nx = _normalize(x, d).astype(jnp.bfloat16)
    q = ln_scale * jnp.dot(nx, w_q_ref[...],
                           preferred_element_type=jnp.float32) + b_q_ref[...]
    kv = jnp.dot(enc_ref[...].astype(jnp.bfloat16), w_kv_ref[...],
                 preferred_element_type=jnp.float32) + b_kv_ref[...]
    k, v = kv[:, :d], kv[:, d:]
    maskz = src_mask_ref[...].astype(jnp.float32) == 0.0
    attn = _mha(q, k, v, maskz, h, dk)
    x = x + (jnp.dot(attn.astype(jnp.bfloat16), wo_c_ref[...],
                     preferred_element_type=jnp.float32) + bo_c_ref[...])

    # -------- residual_connection[2]: feed-forward sublayer --------
    nx = _normalize(x, d).astype(jnp.bfloat16)
    h1 = ln_scale * jnp.dot(nx, w1_ref[...],
                            preferred_element_type=jnp.float32) + b1_ref[...]
    h1 = jnp.maximum(h1, 0.0)                           # ReLU
    y = jnp.dot(h1.astype(jnp.bfloat16), w2_ref[...],
                preferred_element_type=jnp.float32) + b2_ref[...]
    # TODO(synk): dropout after each sublayer omitted (identity / eval mode).
    o_ref[...] = (x + y).astype(o_ref.dtype)


# ------------------------------- wrapper ---------------------------------------
def _prep_mask(mask, B, Sq, Sk):
    """(B,1,Sq,Sk)-broadcastable mask -> (B,Sq,Sk) int8 (4x less DMA than f32)."""
    m = jnp.asarray(mask)
    m = jnp.broadcast_to(m, (B, 1, Sq, Sk))[:, 0]
    return (m != 0).astype(jnp.int8)


def decoder_block(x, encoder_output, src_mask, tgt_mask, params):
    B, Sq, D = x.shape
    Sk = encoder_output.shape[1]
    h = params["h"]
    dk = D // h
    dff = params["w1"].shape[1]

    tgt_m = _prep_mask(tgt_mask, B, Sq, Sq)
    src_m = _prep_mask(src_mask, B, Sq, Sk)

    sa, ca = params["self_attn"], params["cross_attn"]

    kernel = functools.partial(
        _decoder_block_kernel, h=h, dk=dk, d=D, ln_scale=params["ln_scale"])

    def per_b(s1, s2):
        return pl.BlockSpec((None, s1, s2), lambda b: (b, 0, 0))

    def const(s1, s2):
        return pl.BlockSpec((s1, s2), lambda b: (0, 0))

    return pl.pallas_call(
        kernel,
        out_shape=jax.ShapeDtypeStruct((B, Sq, D), jnp.float32),
        grid=(B,),
        in_specs=[
            per_b(Sq, D),                         # x
            per_b(Sk, D),                         # encoder_output
            per_b(Sq, Sq),                        # tgt mask (int8)
            per_b(Sq, Sk),                        # src mask (int8)
            const(D, 3 * D), const(1, 3 * D),     # self-attn fused QKV
            const(D, D),     const(1, D),         # self-attn W_o
            const(D, D),     const(1, D),         # cross-attn Q
            const(D, 2 * D), const(1, 2 * D),     # cross-attn fused KV
            const(D, D),     const(1, D),         # cross-attn W_o
            const(D, dff),   const(1, dff),       # FFN W1
            const(dff, D),   const(1, D),         # FFN W2
        ],
        out_specs=pl.BlockSpec((None, Sq, D), lambda b: (b, 0, 0)),
        compiler_params=_compiler_params(1),
    )(x, encoder_output, tgt_m, src_m,
      sa["w_qkv"], sa["b_qkv"], sa["wo"], sa["bo"],
      ca["w_q"], ca["b_q"], ca["w_kv"], ca["b_kv"], ca["wo"], ca["bo"],
      params["w1"], params["b1"], params["w2"], params["b2"])


# --------------------------------- setup ---------------------------------------
def _init_linear(key, d_in, d_out, scale=0.05):
    kw, kb = jax.random.split(key)
    w = scale * jax.random.normal(kw, (d_in, d_out), dtype=jnp.float32)
    b = scale * jax.random.normal(kb, (d_out,), dtype=jnp.float32)
    return w, b


def init_params(key, d_model, d_ff, h):
    dk = d_model // h
    qscale = 1.0 / math.sqrt(dk)            # folded into the Q projection columns
    ks = jax.random.split(key, 10)

    # self-attention: fused (D, 3D) QKV weight, Q columns pre-scaled by 1/sqrt(dk)
    wq, bq = _init_linear(ks[0], d_model, d_model)
    wk, bk = _init_linear(ks[1], d_model, d_model)
    wv, bv = _init_linear(ks[2], d_model, d_model)
    wo, bo = _init_linear(ks[3], d_model, d_model)
    self_attn = {
        "w_qkv": jnp.concatenate([wq * qscale, wk, wv], axis=1).astype(jnp.bfloat16),
        "b_qkv": jnp.concatenate([bq * qscale, bk, bv], axis=0).reshape(1, -1),
        "wo": wo.astype(jnp.bfloat16), "bo": bo.reshape(1, -1),
    }

    # cross-attention: Q alone (pre-scaled), fused (D, 2D) KV weight
    wq, bq = _init_linear(ks[4], d_model, d_model)
    wk, bk = _init_linear(ks[5], d_model, d_model)
    wv, bv = _init_linear(ks[6], d_model, d_model)
    wo, bo = _init_linear(ks[7], d_model, d_model)
    cross_attn = {
        "w_q": (wq * qscale).astype(jnp.bfloat16),
        "b_q": (bq * qscale).reshape(1, -1),
        "w_kv": jnp.concatenate([wk, wv], axis=1).astype(jnp.bfloat16),
        "b_kv": jnp.concatenate([bk, bv], axis=0).reshape(1, -1),
        "wo": wo.astype(jnp.bfloat16), "bo": bo.reshape(1, -1),
    }

    w1, b1 = _init_linear(ks[8], d_model, d_ff)
    w2, b2 = _init_linear(ks[9], d_ff, d_model)

    # LayerNormalization params (torch.ones(1)); quirk: divide by (std * eps)
    alpha = beta = 1.0
    ln_scale = alpha * beta / EPS
    return {
        "h": h,
        "self_attn": self_attn,
        "cross_attn": cross_attn,
        "w1": w1.astype(jnp.bfloat16), "b1": b1.reshape(1, -1),
        "w2": w2.astype(jnp.bfloat16), "b2": b2.reshape(1, -1),
        "ln_scale": float(ln_scale),
    }


if __name__ == "__main__":
    # Small shapes consistent with the module's forward.
    B, S_tgt, S_src = 2, 8, 16
    d_model, d_ff, h = 32, 64, 4

    root = jax.random.PRNGKey(0)
    k_x, k_enc, k_p = jax.random.split(root, 3)

    x = jax.random.normal(k_x, (B, S_tgt, d_model), dtype=jnp.float32)
    encoder_output = jax.random.normal(k_enc, (B, S_src, d_model), dtype=jnp.float32)

    # causal target mask (B, 1, S_tgt, S_tgt); full source mask (B, 1, S_tgt, S_src)
    tgt_mask = jnp.tril(jnp.ones((S_tgt, S_tgt), dtype=jnp.int32))[None, None].repeat(B, 0)
    src_mask = jnp.ones((B, 1, S_tgt, S_src), dtype=jnp.int32)

    params = init_params(k_p, d_model, d_ff, h)

    out = decoder_block(x, encoder_output, src_mask, tgt_mask, params)
    out = jax.block_until_ready(out)
    assert out.shape == (B, S_tgt, d_model)
    assert bool(jnp.all(jnp.isfinite(out)))
    print("KERNEL_OK")
</pallas_src>

<mosaic_0001>
module attributes {stable_mosaic.version = 11 : i64} {
  func.func @_decoder_block_kernel(%arg0: i32, %arg1: memref<1x8x32xf32, #tpu.memory_space<vmem>>, %arg2: memref<1x16x32xf32, #tpu.memory_space<vmem>>, %arg3: memref<1x8x8xi8, #tpu.memory_space<vmem>>, %arg4: memref<1x8x16xi8, #tpu.memory_space<vmem>>, %arg5: memref<32x96xbf16, #tpu.memory_space<vmem>>, %arg6: memref<1x96xf32, #tpu.memory_space<vmem>>, %arg7: memref<32x32xbf16, #tpu.memory_space<vmem>>, %arg8: memref<1x32xf32, #tpu.memory_space<vmem>>, %arg9: memref<32x32xbf16, #tpu.memory_space<vmem>>, %arg10: memref<1x32xf32, #tpu.memory_space<vmem>>, %arg11: memref<32x64xbf16, #tpu.memory_space<vmem>>, %arg12: memref<1x64xf32, #tpu.memory_space<vmem>>, %arg13: memref<32x32xbf16, #tpu.memory_space<vmem>>, %arg14: memref<1x32xf32, #tpu.memory_space<vmem>>, %arg15: memref<32x64xbf16, #tpu.memory_space<vmem>>, %arg16: memref<1x64xf32, #tpu.memory_space<vmem>>, %arg17: memref<64x32xbf16, #tpu.memory_space<vmem>>, %arg18: memref<1x32xf32, #tpu.memory_space<vmem>>, %arg19: memref<1x8x32xf32, #tpu.memory_space<vmem>>) attributes {dimension_semantics = [#tpu.dimension_semantics<parallel>], iteration_bounds = array<i64: 2>, scalar_prefetch = 0 : i64, scratch_operands = 0 : i64, tpu.core_type = #tpu.core_type<tc>, window_params = [{transform_indices = @transform_0, window_bounds = array<i64: 1, 8, 32>}, {transform_indices = @transform_1, window_bounds = array<i64: 1, 16, 32>}, {transform_indices = @transform_2, window_bounds = array<i64: 1, 8, 8>}, {transform_indices = @transform_3, window_bounds = array<i64: 1, 8, 16>}, {pipeline_mode = #tpu.pipeline_mode<synchronous>, transform_indices = @transform_4, window_bounds = array<i64: 32, 96>}, {pipeline_mode = #tpu.pipeline_mode<synchronous>, transform_indices = @transform_5, window_bounds = array<i64: 1, 96>}, {pipeline_mode = #tpu.pipeline_mode<synchronous>, transform_indices = @transform_6, window_bounds = array<i64: 32, 32>}, {pipeline_mode = #tpu.pipeline_mode<synchronous>, transform_indices = @transform_7, window_bounds = array<i64: 1, 32>}, {pipeline_mode = #tpu.pipeline_mode<synchronous>, transform_indices = @transform_8, window_bounds = array<i64: 32, 32>}, {pipeline_mode = #tpu.pipeline_mode<synchronous>, transform_indices = @transform_9, window_bounds = array<i64: 1, 32>}, {pipeline_mode = #tpu.pipeline_mode<synchronous>, transform_indices = @transform_10, window_bounds = array<i64: 32, 64>}, {pipeline_mode = #tpu.pipeline_mode<synchronous>, transform_indices = @transform_11, window_bounds = array<i64: 1, 64>}, {pipeline_mode = #tpu.pipeline_mode<synchronous>, transform_indices = @transform_12, window_bounds = array<i64: 32, 32>}, {pipeline_mode = #tpu.pipeline_mode<synchronous>, transform_indices = @transform_13, window_bounds = array<i64: 1, 32>}, {pipeline_mode = #tpu.pipeline_mode<synchronous>, transform_indices = @transform_14, window_bounds = array<i64: 32, 64>}, {pipeline_mode = #tpu.pipeline_mode<synchronous>, transform_indices = @transform_15, window_bounds = array<i64: 1, 64>}, {pipeline_mode = #tpu.pipeline_mode<synchronous>, transform_indices = @transform_16, window_bounds = array<i64: 64, 32>}, {pipeline_mode = #tpu.pipeline_mode<synchronous>, transform_indices = @transform_17, window_bounds = array<i64: 1, 32>}, {transform_indices = @transform_18, window_bounds = array<i64: 1, 8, 32>}]} {
    %c0 = arith.constant 0 : index
    %c0_0 = arith.constant 0 : index
    %c0_1 = arith.constant 0 : index
    %0 = vector.load %arg1[%c0, %c0_0, %c0_1] : memref<1x8x32xf32, #tpu.memory_space<vmem>>, vector<1x8x32xf32>
    %1 = vector.shape_cast %0 : vector<1x8x32xf32> to vector<8x32xf32>
    %cst = arith.constant dense<0.000000e+00> : vector<8xf32>
    %2 = vector.multi_reduction <add>, %1, %cst [1] : vector<8x32xf32> to vector<8xf32>
    %3 = vector.shape_cast %2 : vector<8xf32> to vector<8x1xf32>
    %cst_2 = arith.constant 3.200000e+01 : f32
    %4 = vector.broadcast %cst_2 : f32 to vector<8x1xf32>
    %5 = arith.divf %3, %4 : vector<8x1xf32>
    %6 = vector.broadcast %5 : vector<8x1xf32> to vector<8x32xf32>
    %7 = arith.subf %1, %6 : vector<8x32xf32>
    %8 = arith.mulf %7, %7 : vector<8x32xf32>
    %cst_3 = arith.constant dense<0.000000e+00> : vector<8xf32>
    %9 = vector.multi_reduction <add>, %8, %cst_3 [1] : vector<8x32xf32> to vector<8xf32>
    %10 = vector.shape_cast %9 : vector<8xf32> to vector<8x1xf32>
    %cst_4 = arith.constant 0.0322580636 : f32
    %11 = vector.broadcast %cst_4 : f32 to vector<8x1xf32>
    %12 = arith.mulf %10, %11 : vector<8x1xf32>
    %13 = vector.broadcast %5 : vector<8x1xf32> to vector<8x32xf32>
    %14 = arith.subf %1, %13 : vector<8x32xf32>
    %15 = math.rsqrt %12 : vector<8x1xf32>
    %16 = vector.broadcast %15 : vector<8x1xf32> to vector<8x32xf32>
    %17 = arith.mulf %14, %16 : vector<8x32xf32>
    %18 = arith.truncf %17 : vector<8x32xf32> to vector<8x32xbf16>
    %c0_5 = arith.constant 0 : index
    %c0_6 = arith.constant 0 : index
    %19 = vector.load %arg5[%c0_5, %c0_6] : memref<32x96xbf16, #tpu.memory_space<vmem>>, vector<32x96xbf16>
    %cst_7 = arith.constant dense<0.000000e+00> : vector<8x96xf32>
    %20 = tpu.matmul %18, %19, %cst_7 {dimension_numbers = #tpu.dot_dimension_numbers<[1], [0], [0], [1], [0, 0, 1, 1], [], []>} : vector<8x32xbf16>, vector<32x96xbf16>, vector<8x96xf32> -> vector<8x96xf32>
    %cst_8 = arith.constant 1.000000e+06 : f32
    %21 = vector.broadcast %cst_8 : f32 to vector<8x96xf32>
    %22 = arith.mulf %21, %20 : vector<8x96xf32>
    %c0_9 = arith.constant 0 : index
    %c0_10 = arith.constant 0 : index
    %23 = vector.load %arg6[%c0_9, %c0_10] : memref<1x96xf32, #tpu.memory_space<vmem>>, vector<1x96xf32>
    %24 = vector.broadcast %23 : vector<1x96xf32> to vector<8x96xf32>
    %25 = arith.addf %22, %24 : vector<8x96xf32>
    %26 = vector.extract_strided_slice %25 {offsets = [0, 0], sizes = [8, 32], strides = [1, 1]} : vector<8x96xf32> to vector<8x32xf32>
    %27 = vector.extract_strided_slice %25 {offsets = [0, 32], sizes = [8, 32], strides = [1, 1]} : vector<8x96xf32> to vector<8x32xf32>
    %28 = vector.extract_strided_slice %25 {offsets = [0, 64], sizes = [8, 32], strides = [1, 1]} : vector<8x96xf32> to vector<8x32xf32>
    %c0_11 = arith.constant 0 : index
    %c0_12 = arith.constant 0 : index
    %c0_13 = arith.constant 0 : index
    %29 = vector.load %arg3[%c0_11, %c0_12, %c0_13] : memref<1x8x8xi8, #tpu.memory_space<vmem>>, vector<1x8x8xi8>
    %30 = vector.shape_cast %29 : vector<1x8x8xi8> to vector<8x8xi8>
    %31 = arith.sitofp %30 : vector<8x8xi8> to vector<8x8xf32>
    %cst_14 = arith.constant 0.000000e+00 : f32
    %32 = vector.broadcast %cst_14 : f32 to vector<8x8xf32>
    %33 = arith.cmpf oeq, %31, %32 : vector<8x8xf32>
    %34 = vector.extract_strided_slice %26 {offsets = [0, 0], sizes = [8, 8], strides = [1, 1]} : vector<8x32xf32> to vector<8x8xf32>
    %35 = arith.truncf %34 : vector<8x8xf32> to vector<8x8xbf16>
    %36 = vector.extract_strided_slice %27 {offsets = [0, 0], sizes = [8, 8], strides = [1, 1]} : vector<8x32xf32> to vector<8x8xf32>
    %37 = arith.truncf %36 : vector<8x8xf32> to vector<8x8xbf16>
    %38 = vector.extract_strided_slice %28 {offsets = [0, 0], sizes = [8, 8], strides = [1, 1]} : vector<8x32xf32> to vector<8x8xf32>
    %39 = arith.truncf %38 : vector<8x8xf32> to vector<8x8xbf16>
    %cst_15 = arith.constant dense<0.000000e+00> : vector<8x8xf32>
    %40 = tpu.matmul %35, %37, %cst_15 {dimension_numbers = #tpu.dot_dimension_numbers<[1], [1], [0], [0], [0, 0, 1, 0], [], []>} : vector<8x8xbf16>, vector<8x8xbf16>, vector<8x8xf32> -> vector<8x8xf32>
    %cst_16 = arith.constant -1.000000e+09 : f32
    %41 = vector.broadcast %cst_16 : f32 to vector<8x8xf32>
    %42 = arith.select %33, %41, %40 : vector<8x8xi1>, vector<8x8xf32>
    %cst_17 = arith.constant dense<0xFF800000> : vector<8xf32>
    %43 = vector.multi_reduction <maximumf>, %42, %cst_17 [1] : vector<8x8xf32> to vector<8xf32>
    %44 = vector.shape_cast %43 : vector<8xf32> to vector<8x1xf32>
    %45 = vector.broadcast %44 : vector<8x1xf32> to vector<8x8xf32>
    %46 = arith.subf %42, %45 : vector<8x8xf32>
    %47 = math.exp %46 : vector<8x8xf32>
    %cst_18 = arith.constant dense<0.000000e+00> : vector<8xf32>
    %48 = vector.multi_reduction <add>, %47, %cst_18 [1] : vector<8x8xf32> to vector<8xf32>
    %49 = vector.shape_cast %48 : vector<8xf32> to vector<8x1xf32>
    %50 = tpu.reciprocal %49 {approx = true} : vector<8x1xf32> -> vector<8x1xf32>
    %51 = vector.broadcast %50 : vector<8x1xf32> to vector<8x8xf32>
    %52 = arith.mulf %47, %51 : vector<8x8xf32>
    %53 = arith.truncf %52 : vector<8x8xf32> to vector<8x8xbf16>
    %cst_19 = arith.constant dense<0.000000e+00> : vector<8x8xf32>
    %54 = tpu.matmul %53, %39, %cst_19 {dimension_numbers = #tpu.dot_dimension_numbers<[1], [0], [0], [1], [0, 0, 1, 1], [], []>} : vector<8x8xbf16>, vector<8x8xbf16>, vector<8x8xf32> -> vector<8x8xf32>
    %55 = vector.extract_strided_slice %26 {offsets = [0, 8], sizes = [8, 8], strides = [1, 1]} : vector<8x32xf32> to vector<8x8xf32>
    %56 = arith.truncf %55 : vector<8x8xf32> to vector<8x8xbf16>
    %57 = vector.extract_strided_slice %27 {offsets = [0, 8], sizes = [8, 8], strides = [1, 1]} : vector<8x32xf32> to vector<8x8xf32>
    %58 = arith.truncf %57 : vector<8x8xf32> to vector<8x8xbf16>
    %59 = vector.extract_strided_slice %28 {offsets = [0, 8], sizes = [8, 8], strides = [1, 1]} : vector<8x32xf32> to vector<8x8xf32>
    %60 = arith.truncf %59 : vector<8x8xf32> to vector<8x8xbf16>
    %cst_20 = arith.constant dense<0.000000e+00> : vector<8x8xf32>
    %61 = tpu.matmul %56, %58, %cst_20 {dimension_numbers = #tpu.dot_dimension_numbers<[1], [1], [0], [0], [0, 0, 1, 0], [], []>} : vector<8x8xbf16>, vector<8x8xbf16>, vector<8x8xf32> -> vector<8x8xf32>
    %cst_21 = arith.constant -1.000000e+09 : f32
    %62 = vector.broadcast %cst_21 : f32 to vector<8x8xf32>
    %63 = arith.select %33, %62, %61 : vector<8x8xi1>, vector<8x8xf32>
    %cst_22 = arith.constant dense<0xFF800000> : vector<8xf32>
    %64 = vector.multi_reduction <maximumf>, %63, %cst_22 [1] : vector<8x8xf32> to vector<8xf32>
    %65 = vector.shape_cast %64 : vector<8xf32> to vector<8x1xf32>
    %66 = vector.broadcast %65 : vector<8x1xf32> to vector<8x8xf32>
    %67 = arith.subf %63, %66 : vector<8x8xf32>
    %68 = math.exp %67 : vector<8x8xf32>
    %cst_23 = arith.constant dense<0.000000e+00> : vector<8xf32>
    %69 = vector.multi_reduction <add>, %68, %cst_23 [1] : vector<8x8xf32> to vector<8xf32>
    %70 = vector.shape_cast %69 : vector<8xf32> to vector<8x1xf32>
    %71 = tpu.reciprocal %70 {approx = true} : vector<8x1xf32> -> vector<8x1xf32>
    %72 = vector.broadcast %71 : vector<8x1xf32> to vector<8x8xf32>
    %73 = arith.mulf %68, %72 : vector<8x8xf32>
    %74 = arith.truncf %73 : vector<8x8xf32> to vector<8x8xbf16>
    %cst_24 = arith.constant dense<0.000000e+00> : vector<8x8xf32>
    %75 = tpu.matmul %74, %60, %cst_24 {dimension_numbers = #tpu.dot_dimension_numbers<[1], [0], [0], [1], [0, 0, 1, 1], [], []>} : vector<8x8xbf16>, vector<8x8xbf16>, vector<8x8xf32> -> vector<8x8xf32>
    %76 = vector.extract_strided_slice %26 {offsets = [0, 16], sizes = [8, 8], strides = [1, 1]} : vector<8x32xf32> to vector<8x8xf32>
    %77 = arith.truncf %76 : vector<8x8xf32> to vector<8x8xbf16>
    %78 = vector.extract_strided_slice %27 {offsets = [0, 16], sizes = [8, 8], strides = [1, 1]} : vector<8x32xf32> to vector<8x8xf32>
    %79 = arith.truncf %78 : vector<8x8xf32> to vector<8x8xbf16>
    %80 = vector.extract_strided_slice %28 {offsets = [0, 16], sizes = [8, 8], strides = [1, 1]} : vector<8x32xf32> to vector<8x8xf32>
    %81 = arith.truncf %80 : vector<8x8xf32> to vector<8x8xbf16>
    %cst_25 = arith.constant dense<0.000000e+00> : vector<8x8xf32>
    %82 = tpu.matmul %77, %79, %cst_25 {dimension_numbers = #tpu.dot_dimension_numbers<[1], [1], [0], [0], [0, 0, 1, 0], [], []>} : vector<8x8xbf16>, vector<8x8xbf16>, vector<8x8xf32> -> vector<8x8xf32>
    %cst_26 = arith.constant -1.000000e+09 : f32
    %83 = vector.broadcast %cst_26 : f32 to vector<8x8xf32>
    %84 = arith.select %33, %83, %82 : vector<8x8xi1>, vector<8x8xf32>
    %cst_27 = arith.constant dense<0xFF800000> : vector<8xf32>
    %85 = vector.multi_reduction <maximumf>, %84, %cst_27 [1] : vector<8x8xf32> to vector<8xf32>
    %86 = vector.shape_cast %85 : vector<8xf32> to vector<8x1xf32>
    %87 = vector.broadcast %86 : vector<8x1xf32> to vector<8x8xf32>
    %88 = arith.subf %84, %87 : vector<8x8xf32>
    %89 = math.exp %88 : vector<8x8xf32>
    %cst_28 = arith.constant dense<0.000000e+00> : vector<8xf32>
    %90 = vector.multi_reduction <add>, %89, %cst_28 [1] : vector<8x8xf32> to vector<8xf32>
    %91 = vector.shape_cast %90 : vector<8xf32> to vector<8x1xf32>
    %92 = tpu.reciprocal %91 {approx = true} : vector<8x1xf32> -> vector<8x1xf32>
    %93 = vector.broadcast %92 : vector<8x1xf32> to vector<8x8xf32>
    %94 = arith.mulf %89, %93 : vector<8x8xf32>
    %95 = arith.truncf %94 : vector<8x8xf32> to vector<8x8xbf16>
    %cst_29 = arith.constant dense<0.000000e+00> : vector<8x8xf32>
    %96 = tpu.matmul %95, %81, %cst_29 {dimension_numbers = #tpu.dot_dimension_numbers<[1], [0], [0], [1], [0, 0, 1, 1], [], []>} : vector<8x8xbf16>, vector<8x8xbf16>, vector<8x8xf32> -> vector<8x8xf32>
    %97 = vector.extract_strided_slice %26 {offsets = [0, 24], sizes = [8, 8], strides = [1, 1]} : vector<8x32xf32> to vector<8x8xf32>
    %98 = arith.truncf %97 : vector<8x8xf32> to vector<8x8xbf16>
    %99 = vector.extract_strided_slice %27 {offsets = [0, 24], sizes = [8, 8], strides = [1, 1]} : vector<8x32xf32> to vector<8x8xf32>
    %100 = arith.truncf %99 : vector<8x8xf32> to vector<8x8xbf16>
    %101 = vector.extract_strided_slice %28 {offsets = [0, 24], sizes = [8, 8], strides = [1, 1]} : vector<8x32xf32> to vector<8x8xf32>
    %102 = arith.truncf %101 : vector<8x8xf32> to vector<8x8xbf16>
    %cst_30 = arith.constant dense<0.000000e+00> : vector<8x8xf32>
    %103 = tpu.matmul %98, %100, %cst_30 {dimension_numbers = #tpu.dot_dimension_numbers<[1], [1], [0], [0], [0, 0, 1, 0], [], []>} : vector<8x8xbf16>, vector<8x8xbf16>, vector<8x8xf32> -> vector<8x8xf32>
    %cst_31 = arith.constant -1.000000e+09 : f32
    %104 = vector.broadcast %cst_31 : f32 to vector<8x8xf32>
    %105 = arith.select %33, %104, %103 : vector<8x8xi1>, vector<8x8xf32>
    %cst_32 = arith.constant dense<0xFF800000> : vector<8xf32>
    %106 = vector.multi_reduction <maximumf>, %105, %cst_32 [1] : vector<8x8xf32> to vector<8xf32>
    %107 = vector.shape_cast %106 : vector<8xf32> to vector<8x1xf32>
    %108 = vector.broadcast %107 : vector<8x1xf32> to vector<8x8xf32>
    %109 = arith.subf %105, %108 : vector<8x8xf32>
    %110 = math.exp %109 : vector<8x8xf32>
    %cst_33 = arith.constant dense<0.000000e+00> : vector<8xf32>
    %111 = vector.multi_reduction <add>, %110, %cst_33 [1] : vector<8x8xf32> to vector<8xf32>
    %112 = vector.shape_cast %111 : vector<8xf32> to vector<8x1xf32>
    %113 = tpu.reciprocal %112 {approx = true} : vector<8x1xf32> -> vector<8x1xf32>
    %114 = vector.broadcast %113 : vector<8x1xf32> to vector<8x8xf32>
    %115 = arith.mulf %110, %114 : vector<8x8xf32>
    %116 = arith.truncf %115 : vector<8x8xf32> to vector<8x8xbf16>
    %cst_34 = arith.constant dense<0.000000e+00> : vector<8x8xf32>
    %117 = tpu.matmul %116, %102, %cst_34 {dimension_numbers = #tpu.dot_dimension_numbers<[1], [0], [0], [1], [0, 0, 1, 1], [], []>} : vector<8x8xbf16>, vector<8x8xbf16>, vector<8x8xf32> -> vector<8x8xf32>
    %118 = tpu.concatenate %54, %75, %96, %117 in 1 : vector<8x8xf32>, vector<8x8xf32>, vector<8x8xf32>, vector<8x8xf32> -> vector<8x32xf32>
    %119 = arith.truncf %118 : vector<8x32xf32> to vector<8x32xbf16>
    %c0_35 = arith.constant 0 : index
    %c0_36 = arith.constant 0 : index
    %120 = vector.load %arg7[%c0_35, %c0_36] : memref<32x32xbf16, #tpu.memory_space<vmem>>, vector<32x32xbf16>
    %cst_37 = arith.constant dense<0.000000e+00> : vector<8x32xf32>
    %121 = tpu.matmul %119, %120, %cst_37 {dimension_numbers = #tpu.dot_dimension_numbers<[1], [0], [0], [1], [0, 0, 1, 1], [], []>} : vector<8x32xbf16>, vector<32x32xbf16>, vector<8x32xf32> -> vector<8x32xf32>
    %c0_38 = arith.constant 0 : index
    %c0_39 = arith.constant 0 : index
    %122 = vector.load %arg8[%c0_38, %c0_39] : memref<1x32xf32, #tpu.memory_space<vmem>>, vector<1x32xf32>
    %123 = vector.broadcast %122 : vector<1x32xf32> to vector<8x32xf32>
    %124 = arith.addf %121, %123 : vector<8x32xf32>
    %125 = arith.addf %1, %124 : vector<8x32xf32>
    %cst_40 = arith.constant dense<0.000000e+00> : vector<8xf32>
    %126 = vector.multi_reduction <add>, %125, %cst_40 [1] : vector<8x32xf32> to vector<8xf32>
    %127 = vector.shape_cast %126 : vector<8xf32> to vector<8x1xf32>
    %cst_41 = arith.constant 3.200000e+01 : f32
    %128 = vector.broadcast %cst_41 : f32 to vector<8x1xf32>
    %129 = arith.divf %127, %128 : vector<8x1xf32>
    %130 = vector.broadcast %129 : vector<8x1xf32> to vector<8x32xf32>
    %131 = arith.subf %125, %130 : vector<8x32xf32>
    %132 = arith.mulf %131, %131 : vector<8x32xf32>
    %cst_42 = arith.constant dense<0.000000e+00> : vector<8xf32>
    %133 = vector.multi_reduction <add>, %132, %cst_42 [1] : vector<8x32xf32> to vector<8xf32>
    %134 = vector.shape_cast %133 : vector<8xf32> to vector<8x1xf32>
    %cst_43 = arith.constant 0.0322580636 : f32
    %135 = vector.broadcast %cst_43 : f32 to vector<8x1xf32>
    %136 = arith.mulf %134, %135 : vector<8x1xf32>
    %137 = vector.broadcast %129 : vector<8x1xf32> to vector<8x32xf32>
    %138 = arith.subf %125, %137 : vector<8x32xf32>
    %139 = math.rsqrt %136 : vector<8x1xf32>
    %140 = vector.broadcast %139 : vector<8x1xf32> to vector<8x32xf32>
    %141 = arith.mulf %138, %140 : vector<8x32xf32>
    %142 = arith.truncf %141 : vector<8x32xf32> to vector<8x32xbf16>
    %c0_44 = arith.constant 0 : index
    %c0_45 = arith.constant 0 : index
    %143 = vector.load %arg9[%c0_44, %c0_45] : memref<32x32xbf16, #tpu.memory_space<vmem>>, vector<32x32xbf16>
    %cst_46 = arith.constant dense<0.000000e+00> : vector<8x32xf32>
    %144 = tpu.matmul %142, %143, %cst_46 {dimension_numbers = #tpu.dot_dimension_numbers<[1], [0], [0], [1], [0, 0, 1, 1], [], []>} : vector<8x32xbf16>, vector<32x32xbf16>, vector<8x32xf32> -> vector<8x32xf32>
    %cst_47 = arith.constant 1.000000e+06 : f32
    %145 = vector.broadcast %cst_47 : f32 to vector<8x32xf32>
    %146 = arith.mulf %145, %144 : vector<8x32xf32>
    %c0_48 = arith.constant 0 : index
    %c0_49 = arith.constant 0 : index
    %147 = vector.load %arg10[%c0_48, %c0_49] : memref<1x32xf32, #tpu.memory_space<vmem>>, vector<1x32xf32>
    %148 = vector.broadcast %147 : vector<1x32xf32> to vector<8x32xf32>
    %149 = arith.addf %146, %148 : vector<8x32xf32>
    %c0_50 = arith.constant 0 : index
    %c0_51 = arith.constant 0 : index
    %c0_52 = arith.constant 0 : index
    %150 = vector.load %arg2[%c0_50, %c0_51, %c0_52] : memref<1x16x32xf32, #tpu.memory_space<vmem>>, vector<1x16x32xf32>
    %151 = vector.shape_cast %150 : vector<1x16x32xf32> to vector<16x32xf32>
    %152 = arith.truncf %151 : vector<16x32xf32> to vector<16x32xbf16>
    %c0_53 = arith.constant 0 : index
    %c0_54 = arith.constant 0 : index
    %153 = vector.load %arg11[%c0_53, %c0_54] : memref<32x64xbf16, #tpu.memory_space<vmem>>, vector<32x64xbf16>
    %cst_55 = arith.constant dense<0.000000e+00> : vector<16x64xf32>
    %154 = tpu.matmul %152, %153, %cst_55 {dimension_numbers = #tpu.dot_dimension_numbers<[1], [0], [0], [1], [0, 0, 1, 1], [], []>} : vector<16x32xbf16>, vector<32x64xbf16>, vector<16x64xf32> -> vector<16x64xf32>
    %c0_56 = arith.constant 0 : index
    %c0_57 = arith.constant 0 : index
    %155 = vector.load %arg12[%c0_56, %c0_57] : memref<1x64xf32, #tpu.memory_space<vmem>>, vector<1x64xf32>
    %156 = vector.broadcast %155 : vector<1x64xf32> to vector<16x64xf32>
    %157 = arith.addf %154, %156 : vector<16x64xf32>
    %158 = vector.extract_strided_slice %157 {offsets = [0, 0], sizes = [16, 32], strides = [1, 1]} : vector<16x64xf32> to vector<16x32xf32>
    %159 = vector.extract_strided_slice %157 {offsets = [0, 32], sizes = [16, 32], strides = [1, 1]} : vector<16x64xf32> to vector<16x32xf32>
    %c0_58 = arith.constant 0 : index
    %c0_59 = arith.constant 0 : index
    %c0_60 = arith.constant 0 : index
    %160 = vector.load %arg4[%c0_58, %c0_59, %c0_60] : memref<1x8x16xi8, #tpu.memory_space<vmem>>, vector<1x8x16xi8>
    %161 = vector.shape_cast %160 : vector<1x8x16xi8> to vector<8x16xi8>
    %162 = arith.sitofp %161 : vector<8x16xi8> to vector<8x16xf32>
    %cst_61 = arith.constant 0.000000e+00 : f32
    %163 = vector.broadcast %cst_61 : f32 to vector<8x16xf32>
    %164 = arith.cmpf oeq, %162, %163 : vector<8x16xf32>
    %165 = vector.extract_strided_slice %149 {offsets = [0, 0], sizes = [8, 8], strides = [1, 1]} : vector<8x32xf32> to vector<8x8xf32>
    %166 = arith.truncf %165 : vector<8x8xf32> to vector<8x8xbf16>
    %167 = vector.extract_strided_slice %158 {offsets = [0, 0], sizes = [16, 8], strides = [1, 1]} : vector<16x32xf32> to vector<16x8xf32>
    %168 = arith.truncf %167 : vector<16x8xf32> to vector<16x8xbf16>
    %169 = vector.extract_strided_slice %159 {offsets = [0, 0], sizes = [16, 8], strides = [1, 1]} : vector<16x32xf32> to vector<16x8xf32>
    %170 = arith.truncf %169 : vector<16x8xf32> to vector<16x8xbf16>
    %cst_62 = arith.constant dense<0.000000e+00> : vector<8x16xf32>
    %171 = tpu.matmul %166, %168, %cst_62 {dimension_numbers = #tpu.dot_dimension_numbers<[1], [1], [0], [0], [0, 0, 1, 0], [], []>} : vector<8x8xbf16>, vector<16x8xbf16>, vector<8x16xf32> -> vector<8x16xf32>
    %cst_63 = arith.constant -1.000000e+09 : f32
    %172 = vector.broadcast %cst_63 : f32 to vector<8x16xf32>
    %173 = arith.select %164, %172, %171 : vector<8x16xi1>, vector<8x16xf32>
    %cst_64 = arith.constant dense<0xFF800000> : vector<8xf32>
    %174 = vector.multi_reduction <maximumf>, %173, %cst_64 [1] : vector<8x16xf32> to vector<8xf32>
    %175 = vector.shape_cast %174 : vector<8xf32> to vector<8x1xf32>
    %176 = vector.broadcast %175 : vector<8x1xf32> to vector<8x16xf32>
    %177 = arith.subf %173, %176 : vector<8x16xf32>
    %178 = math.exp %177 : vector<8x16xf32>
    %cst_65 = arith.constant dense<0.000000e+00> : vector<8xf32>
    %179 = vector.multi_reduction <add>, %178, %cst_65 [1] : vector<8x16xf32> to vector<8xf32>
    %180 = vector.shape_cast %179 : vector<8xf32> to vector<8x1xf32>
    %181 = tpu.reciprocal %180 {approx = true} : vector<8x1xf32> -> vector<8x1xf32>
    %182 = vector.broadcast %181 : vector<8x1xf32> to vector<8x16xf32>
    %183 = arith.mulf %178, %182 : vector<8x16xf32>
    %184 = arith.truncf %183 : vector<8x16xf32> to vector<8x16xbf16>
    %cst_66 = arith.constant dense<0.000000e+00> : vector<8x8xf32>
    %185 = tpu.matmul %184, %170, %cst_66 {dimension_numbers = #tpu.dot_dimension_numbers<[1], [0], [0], [1], [0, 0, 1, 1], [], []>} : vector<8x16xbf16>, vector<16x8xbf16>, vector<8x8xf32> -> vector<8x8xf32>
    %186 = vector.extract_strided_slice %149 {offsets = [0, 8], sizes = [8, 8], strides = [1, 1]} : vector<8x32xf32> to vector<8x8xf32>
    %187 = arith.truncf %186 : vector<8x8xf32> to vector<8x8xbf16>
    %188 = vector.extract_strided_slice %158 {offsets = [0, 8], sizes = [16, 8], strides = [1, 1]} : vector<16x32xf32> to vector<16x8xf32>
    %189 = arith.truncf %188 : vector<16x8xf32> to vector<16x8xbf16>
    %190 = vector.extract_strided_slice %159 {offsets = [0, 8], sizes = [16, 8], strides = [1, 1]} : vector<16x32xf32> to vector<16x8xf32>
    %191 = arith.truncf %190 : vector<16x8xf32> to vector<16x8xbf16>
    %cst_67 = arith.constant dense<0.000000e+00> : vector<8x16xf32>
    %192 = tpu.matmul %187, %189, %cst_67 {dimension_numbers = #tpu.dot_dimension_numbers<[1], [1], [0], [0], [0, 0, 1, 0], [], []>} : vector<8x8xbf16>, vector<16x8xbf16>, vector<8x16xf32> -> vector<8x16xf32>
    %cst_68 = arith.constant -1.000000e+09 : f32
    %193 = vector.broadcast %cst_68 : f32 to vector<8x16xf32>
    %194 = arith.select %164, %193, %192 : vector<8x16xi1>, vector<8x16xf32>
    %cst_69 = arith.constant dense<0xFF800000> : vector<8xf32>
    %195 = vector.multi_reduction <maximumf>, %194, %cst_69 [1] : vector<8x16xf32> to vector<8xf32>
    %196 = vector.shape_cast %195 : vector<8xf32> to vector<8x1xf32>
    %197 = vector.broadcast %196 : vector<8x1xf32> to vector<8x16xf32>
    %198 = arith.subf %194, %197 : vector<8x16xf32>
    %199 = math.exp %198 : vector<8x16xf32>
    %cst_70 = arith.constant dense<0.000000e+00> : vector<8xf32>
    %200 = vector.multi_reduction <add>, %199, %cst_70 [1] : vector<8x16xf32> to vector<8xf32>
    %201 = vector.shape_cast %200 : vector<8xf32> to vector<8x1xf32>
    %202 = tpu.reciprocal %201 {approx = true} : vector<8x1xf32> -> vector<8x1xf32>
    %203 = vector.broadcast %202 : vector<8x1xf32> to vector<8x16xf32>
    %204 = arith.mulf %199, %203 : vector<8x16xf32>
    %205 = arith.truncf %204 : vector<8x16xf32> to vector<8x16xbf16>
    %cst_71 = arith.constant dense<0.000000e+00> : vector<8x8xf32>
    %206 = tpu.matmul %205, %191, %cst_71 {dimension_numbers = #tpu.dot_dimension_numbers<[1], [0], [0], [1], [0, 0, 1, 1], [], []>} : vector<8x16xbf16>, vector<16x8xbf16>, vector<8x8xf32> -> vector<8x8xf32>
    %207 = vector.extract_strided_slice %149 {offsets = [0, 16], sizes = [8, 8], strides = [1, 1]} : vector<8x32xf32> to vector<8x8xf32>
    %208 = arith.truncf %207 : vector<8x8xf32> to vector<8x8xbf16>
    %209 = vector.extract_strided_slice %158 {offsets = [0, 16], sizes = [16, 8], strides = [1, 1]} : vector<16x32xf32> to vector<16x8xf32>
    %210 = arith.truncf %209 : vector<16x8xf32> to vector<16x8xbf16>
    %211 = vector.extract_strided_slice %159 {offsets = [0, 16], sizes = [16, 8], strides = [1, 1]} : vector<16x32xf32> to vector<16x8xf32>
    %212 = arith.truncf %211 : vector<16x8xf32> to vector<16x8xbf16>
    %cst_72 = arith.constant dense<0.000000e+00> : vector<8x16xf32>
    %213 = tpu.matmul %208, %210, %cst_72 {dimension_numbers = #tpu.dot_dimension_numbers<[1], [1], [0], [0], [0, 0, 1, 0], [], []>} : vector<8x8xbf16>, vector<16x8xbf16>, vector<8x16xf32> -> vector<8x16xf32>
    %cst_73 = arith.constant -1.000000e+09 : f32
    %214 = vector.broadcast %cst_73 : f32 to vector<8x16xf32>
    %215 = arith.select %164, %214, %213 : vector<8x16xi1>, vector<8x16xf32>
    %cst_74 = arith.constant dense<0xFF800000> : vector<8xf32>
    %216 = vector.multi_reduction <maximumf>, %215, %cst_74 [1] : vector<8x16xf32> to vector<8xf32>
    %217 = vector.shape_cast %216 : vector<8xf32> to vector<8x1xf32>
    %218 = vector.broadcast %217 : vector<8x1xf32> to vector<8x16xf32>
    %219 = arith.subf %215, %218 : vector<8x16xf32>
    %220 = math.exp %219 : vector<8x16xf32>
    %cst_75 = arith.constant dense<0.000000e+00> : vector<8xf32>
    %221 = vector.multi_reduction <add>, %220, %cst_75 [1] : vector<8x16xf32> to vector<8xf32>
    %222 = vector.shape_cast %221 : vector<8xf32> to vector<8x1xf32>
    %223 = tpu.reciprocal %222 {approx = true} : vector<8x1xf32> -> vector<8x1xf32>
    %224 = vector.broadcast %223 : vector<8x1xf32> to vector<8x16xf32>
    %225 = arith.mulf %220, %224 : vector<8x16xf32>
    %226 = arith.truncf %225 : vector<8x16xf32> to vector<8x16xbf16>
    %cst_76 = arith.constant dense<0.000000e+00> : vector<8x8xf32>
    %227 = tpu.matmul %226, %212, %cst_76 {dimension_numbers = #tpu.dot_dimension_numbers<[1], [0], [0], [1], [0, 0, 1, 1], [], []>} : vector<8x16xbf16>, vector<16x8xbf16>, vector<8x8xf32> -> vector<8x8xf32>
    %228 = vector.extract_strided_slice %149 {offsets = [0, 24], sizes = [8, 8], strides = [1, 1]} : vector<8x32xf32> to vector<8x8xf32>
    %229 = arith.truncf %228 : vector<8x8xf32> to vector<8x8xbf16>
    %230 = vector.extract_strided_slice %158 {offsets = [0, 24], sizes = [16, 8], strides = [1, 1]} : vector<16x32xf32> to vector<16x8xf32>
    %231 = arith.truncf %230 : vector<16x8xf32> to vector<16x8xbf16>
    %232 = vector.extract_strided_slice %159 {offsets = [0, 24], sizes = [16, 8], strides = [1, 1]} : vector<16x32xf32> to vector<16x8xf32>
    %233 = arith.truncf %232 : vector<16x8xf32> to vector<16x8xbf16>
    %cst_77 = arith.constant dense<0.000000e+00> : vector<8x16xf32>
    %234 = tpu.matmul %229, %231, %cst_77 {dimension_numbers = #tpu.dot_dimension_numbers<[1], [1], [0], [0], [0, 0, 1, 0], [], []>} : vector<8x8xbf16>, vector<16x8xbf16>, vector<8x16xf32> -> vector<8x16xf32>
    %cst_78 = arith.constant -1.000000e+09 : f32
    %235 = vector.broadcast %cst_78 : f32 to vector<8x16xf32>
    %236 = arith.select %164, %235, %234 : vector<8x16xi1>, vector<8x16xf32>
    %cst_79 = arith.constant dense<0xFF800000> : vector<8xf32>
    %237 = vector.multi_reduction <maximumf>, %236, %cst_79 [1] : vector<8x16xf32> to vector<8xf32>
    %238 = vector.shape_cast %237 : vector<8xf32> to vector<8x1xf32>
    %239 = vector.broadcast %238 : vector<8x1xf32> to vector<8x16xf32>
    %240 = arith.subf %236, %239 : vector<8x16xf32>
    %241 = math.exp %240 : vector<8x16xf32>
    %cst_80 = arith.constant dense<0.000000e+00> : vector<8xf32>
    %242 = vector.multi_reduction <add>, %241, %cst_80 [1] : vector<8x16xf32> to vector<8xf32>
    %243 = vector.shape_cast %242 : vector<8xf32> to vector<8x1xf32>
    %244 = tpu.reciprocal %243 {approx = true} : vector<8x1xf32> -> vector<8x1xf32>
    %245 = vector.broadcast %244 : vector<8x1xf32> to vector<8x16xf32>
    %246 = arith.mulf %241, %245 : vector<8x16xf32>
    %247 = arith.truncf %246 : vector<8x16xf32> to vector<8x16xbf16>
    %cst_81 = arith.constant dense<0.000000e+00> : vector<8x8xf32>
    %248 = tpu.matmul %247, %233, %cst_81 {dimension_numbers = #tpu.dot_dimension_numbers<[1], [0], [0], [1], [0, 0, 1, 1], [], []>} : vector<8x16xbf16>, vector<16x8xbf16>, vector<8x8xf32> -> vector<8x8xf32>
    %249 = tpu.concatenate %185, %206, %227, %248 in 1 : vector<8x8xf32>, vector<8x8xf32>, vector<8x8xf32>, vector<8x8xf32> -> vector<8x32xf32>
    %250 = arith.truncf %249 : vector<8x32xf32> to vector<8x32xbf16>
    %c0_82 = arith.constant 0 : index
    %c0_83 = arith.constant 0 : index
    %251 = vector.load %arg13[%c0_82, %c0_83] : memref<32x32xbf16, #tpu.memory_space<vmem>>, vector<32x32xbf16>
    %cst_84 = arith.constant dense<0.000000e+00> : vector<8x32xf32>
    %252 = tpu.matmul %250, %251, %cst_84 {dimension_numbers = #tpu.dot_dimension_numbers<[1], [0], [0], [1], [0, 0, 1, 1], [], []>} : vector<8x32xbf16>, vector<32x32xbf16>, vector<8x32xf32> -> vector<8x32xf32>
    %c0_85 = arith.constant 0 : index
    %c0_86 = arith.constant 0 : index
    %253 = vector.load %arg14[%c0_85, %c0_86] : memref<1x32xf32, #tpu.memory_space<vmem>>, vector<1x32xf32>
    %254 = vector.broadcast %253 : vector<1x32xf32> to vector<8x32xf32>
    %255 = arith.addf %252, %254 : vector<8x32xf32>
    %256 = arith.addf %125, %255 : vector<8x32xf32>
    %cst_87 = arith.constant dense<0.000000e+00> : vector<8xf32>
    %257 = vector.multi_reduction <add>, %256, %cst_87 [1] : vector<8x32xf32> to vector<8xf32>
    %258 = vector.shape_cast %257 : vector<8xf32> to vector<8x1xf32>
    %cst_88 = arith.constant 3.200000e+01 : f32
    %259 = vector.broadcast %cst_88 : f32 to vector<8x1xf32>
    %260 = arith.divf %258, %259 : vector<8x1xf32>
    %261 = vector.broadcast %260 : vector<8x1xf32> to vector<8x32xf32>
    %262 = arith.subf %256, %261 : vector<8x32xf32>
    %263 = arith.mulf %262, %262 : vector<8x32xf32>
    %cst_89 = arith.constant dense<0.000000e+00> : vector<8xf32>
    %264 = vector.multi_reduction <add>, %263, %cst_89 [1] : vector<8x32xf32> to vector<8xf32>
    %265 = vector.shape_cast %264 : vector<8xf32> to vector<8x1xf32>
    %cst_90 = arith.constant 0.0322580636 : f32
    %266 = vector.broadcast %cst_90 : f32 to vector<8x1xf32>
    %267 = arith.mulf %265, %266 : vector<8x1xf32>
    %268 = vector.broadcast %260 : vector<8x1xf32> to vector<8x32xf32>
    %269 = arith.subf %256, %268 : vector<8x32xf32>
    %270 = math.rsqrt %267 : vector<8x1xf32>
    %271 = vector.broadcast %270 : vector<8x1xf32> to vector<8x32xf32>
    %272 = arith.mulf %269, %271 : vector<8x32xf32>
    %273 = arith.truncf %272 : vector<8x32xf32> to vector<8x32xbf16>
    %c0_91 = arith.constant 0 : index
    %c0_92 = arith.constant 0 : index
    %274 = vector.load %arg15[%c0_91, %c0_92] : memref<32x64xbf16, #tpu.memory_space<vmem>>, vector<32x64xbf16>
    %cst_93 = arith.constant dense<0.000000e+00> : vector<8x64xf32>
    %275 = tpu.matmul %273, %274, %cst_93 {dimension_numbers = #tpu.dot_dimension_numbers<[1], [0], [0], [1], [0, 0, 1, 1], [], []>} : vector<8x32xbf16>, vector<32x64xbf16>, vector<8x64xf32> -> vector<8x64xf32>
    %cst_94 = arith.constant 1.000000e+06 : f32
    %276 = vector.broadcast %cst_94 : f32 to vector<8x64xf32>
    %277 = arith.mulf %276, %275 : vector<8x64xf32>
    %c0_95 = arith.constant 0 : index
    %c0_96 = arith.constant 0 : index
    %278 = vector.load %arg16[%c0_95, %c0_96] : memref<1x64xf32, #tpu.memory_space<vmem>>, vector<1x64xf32>
    %279 = vector.broadcast %278 : vector<1x64xf32> to vector<8x64xf32>
    %280 = arith.addf %277, %279 : vector<8x64xf32>
    %cst_97 = arith.constant 0.000000e+00 : f32
    %281 = vector.broadcast %cst_97 : f32 to vector<8x64xf32>
    %282 = arith.maximumf %280, %281 : vector<8x64xf32>
    %283 = arith.truncf %282 : vector<8x64xf32> to vector<8x64xbf16>
    %c0_98 = arith.constant 0 : index
    %c0_99 = arith.constant 0 : index
    %284 = vector.load %arg17[%c0_98, %c0_99] : memref<64x32xbf16, #tpu.memory_space<vmem>>, vector<64x32xbf16>
    %cst_100 = arith.constant dense<0.000000e+00> : vector<8x32xf32>
    %285 = tpu.matmul %283, %284, %cst_100 {dimension_numbers = #tpu.dot_dimension_numbers<[1], [0], [0], [1], [0, 0, 1, 1], [], []>} : vector<8x64xbf16>, vector<64x32xbf16>, vector<8x32xf32> -> vector<8x32xf32>
    %c0_101 = arith.constant 0 : index
    %c0_102 = arith.constant 0 : index
    %286 = vector.load %arg18[%c0_101, %c0_102] : memref<1x32xf32, #tpu.memory_space<vmem>>, vector<1x32xf32>
    %287 = vector.broadcast %286 : vector<1x32xf32> to vector<8x32xf32>
    %288 = arith.addf %285, %287 : vector<8x32xf32>
    %289 = arith.addf %256, %288 : vector<8x32xf32>
    %c0_103 = arith.constant 0 : index
    %c0_104 = arith.constant 0 : index
    %c0_105 = arith.constant 0 : index
    %290 = vector.load %arg19[%c0_103, %c0_104, %c0_105] : memref<1x8x32xf32, #tpu.memory_space<vmem>>, vector<1x8x32xf32>
    %291 = vector.shape_cast %290 : vector<1x8x32xf32> to vector<8x32xf32>
    %292 = vector.shape_cast %289 : vector<8x32xf32> to vector<1x8x32xf32>
    tpu.vector_store %arg19[%c0_103, %c0_104, %c0_105], %292 {strides = array<i32>} : memref<1x8x32xf32, #tpu.memory_space<vmem>>, vector<1x8x32xf32>,
    return
  }
  func.func @transform_0(%arg0: i32) -> (i32, i32, i32) {
    %c0_i32 = arith.constant 0 : i32
    %c0_i32_0 = arith.constant 0 : i32
    %c0_i32_1 = arith.constant 0 : i32
    return %arg0, %c0_i32, %c0_i32_0 : i32, i32, i32
  }
  func.func @transform_1(%arg0: i32) -> (i32, i32, i32) {
    %c0_i32 = arith.constant 0 : i32
    %c0_i32_0 = arith.constant 0 : i32
    %c0_i32_1 = arith.constant 0 : i32
    return %arg0, %c0_i32, %c0_i32_0 : i32, i32, i32
  }
  func.func @transform_2(%arg0: i32) -> (i32, i32, i32) {
    %c0_i32 = arith.constant 0 : i32
    %c0_i32_0 = arith.constant 0 : i32
    %c0_i32_1 = arith.constant 0 : i32
    return %arg0, %c0_i32, %c0_i32_0 : i32, i32, i32
  }
  func.func @transform_3(%arg0: i32) -> (i32, i32, i32) {
    %c0_i32 = arith.constant 0 : i32
    %c0_i32_0 = arith.constant 0 : i32
    %c0_i32_1 = arith.constant 0 : i32
    return %arg0, %c0_i32, %c0_i32_0 : i32, i32, i32
  }
  func.func @transform_4(%arg0: i32) -> (i32, i32) {
    %c0_i32 = arith.constant 0 : i32
    %c0_i32_0 = arith.constant 0 : i32
    %c0_i32_1 = arith.constant 0 : i32
    return %c0_i32, %c0_i32_0 : i32, i32
  }
  func.func @transform_5(%arg0: i32) -> (i32, i32) {
    %c0_i32 = arith.constant 0 : i32
    %c0_i32_0 = arith.constant 0 : i32
    %c0_i32_1 = arith.constant 0 : i32
    return %c0_i32, %c0_i32_0 : i32, i32
  }
  func.func @transform_6(%arg0: i32) -> (i32, i32) {
    %c0_i32 = arith.constant 0 : i32
    %c0_i32_0 = arith.constant 0 : i32
    %c0_i32_1 = arith.constant 0 : i32
    return %c0_i32, %c0_i32_0 : i32, i32
  }
  func.func @transform_7(%arg0: i32) -> (i32, i32) {
    %c0_i32 = arith.constant 0 : i32
    %c0_i32_0 = arith.constant 0 : i32
    %c0_i32_1 = arith.constant 0 : i32
    return %c0_i32, %c0_i32_0 : i32, i32
  }
  func.func @transform_8(%arg0: i32) -> (i32, i32) {
    %c0_i32 = arith.constant 0 : i32
    %c0_i32_0 = arith.constant 0 : i32
    %c0_i32_1 = arith.constant 0 : i32
    return %c0_i32, %c0_i32_0 : i32, i32
  }
  func.func @transform_9(%arg0: i32) -> (i32, i32) {
    %c0_i32 = arith.constant 0 : i32
    %c0_i32_0 = arith.constant 0 : i32
    %c0_i32_1 = arith.constant 0 : i32
    return %c0_i32, %c0_i32_0 : i32, i32
  }
  func.func @transform_10(%arg0: i32) -> (i32, i32) {
    %c0_i32 = arith.constant 0 : i32
    %c0_i32_0 = arith.constant 0 : i32
    %c0_i32_1 = arith.constant 0 : i32
    return %c0_i32, %c0_i32_0 : i32, i32
  }
  func.func @transform_11(%arg0: i32) -> (i32, i32) {
    %c0_i32 = arith.constant 0 : i32
    %c0_i32_0 = arith.constant 0 : i32
    %c0_i32_1 = arith.constant 0 : i32
    return %c0_i32, %c0_i32_0 : i32, i32
  }
  func.func @transform_12(%arg0: i32) -> (i32, i32) {
    %c0_i32 = arith.constant 0 : i32
    %c0_i32_0 = arith.constant 0 : i32
    %c0_i32_1 = arith.constant 0 : i32
    return %c0_i32, %c0_i32_0 : i32, i32
  }
  func.func @transform_13(%arg0: i32) -> (i32, i32) {
    %c0_i32 = arith.constant 0 : i32
    %c0_i32_0 = arith.constant 0 : i32
    %c0_i32_1 = arith.constant 0 : i32
    return %c0_i32, %c0_i32_0 : i32, i32
  }
  func.func @transform_14(%arg0: i32) -> (i32, i32) {
    %c0_i32 = arith.constant 0 : i32
    %c0_i32_0 = arith.constant 0 : i32
    %c0_i32_1 = arith.constant 0 : i32
    return %c0_i32, %c0_i32_0 : i32, i32
  }
  func.func @transform_15(%arg0: i32) -> (i32, i32) {
    %c0_i32 = arith.constant 0 : i32
    %c0_i32_0 = arith.constant 0 : i32
    %c0_i32_1 = arith.constant 0 : i32
    return %c0_i32, %c0_i32_0 : i32, i32
  }
  func.func @transform_16(%arg0: i32) -> (i32, i32) {
    %c0_i32 = arith.constant 0 : i32
    %c0_i32_0 = arith.constant 0 : i32
    %c0_i32_1 = arith.constant 0 : i32
    return %c0_i32, %c0_i32_0 : i32, i32
  }
  func.func @transform_17(%arg0: i32) -> (i32, i32) {
    %c0_i32 = arith.constant 0 : i32
    %c0_i32_0 = arith.constant 0 : i32
    %c0_i32_1 = arith.constant 0 : i32
    return %c0_i32, %c0_i32_0 : i32, i32
  }
  func.func @transform_18(%arg0: i32) -> (i32, i32, i32) {
    %c0_i32 = arith.constant 0 : i32
    %c0_i32_0 = arith.constant 0 : i32
    %c0_i32_1 = arith.constant 0 : i32
    return %arg0, %c0_i32, %c0_i32_0 : i32, i32, i32
  }
}

</mosaic_0001>

<bundles_post_ra>
// kernel: tpu_custom_call.1
= control target key start
LH: loop header
LB: loop body
LE: loop exit
PB: predicated region body
PF: predicated region fallthrough
CT: control target
= control target key end

     0   :  { %s4108_s0 = inlined_call_operand.vmem [shape: f32[2,8,32], index: 0, kind: input, shape index: {}]   ;;  %s4109_s1 = inlined_call_operand.vmem [shape: f32[2,16,32], index: 1, kind: input, shape index: {}]   ;;  %s4110_s2 = inlined_call_operand.hbm [shape: s8[2,8,8], index: 2, kind: input, shape index: {}]   ;;  %s4111_s3 = inlined_call_operand.hbm [shape: s8[2,8,16], index: 3, kind: input, shape index: {}]   ;;  %s4112_s4 = inlined_call_operand.hbm [shape: bf16[32,96], index: 4, kind: input, shape index: {}]   ;;  %s4113_s5 = inlined_call_operand.vmem [shape: f32[1,96], index: 5, kind: input, shape index: {}]   ;;  %s4114_s6 = inlined_call_operand.hbm [shape: bf16[32,32], index: 6, kind: input, shape index: {}]   ;;  %s4115_s7 = inlined_call_operand.hbm [shape: f32[1,32], index: 7, kind: input, shape index: {}]   ;;  %s4116_s8 = inlined_call_operand.hbm [shape: bf16[32,32], index: 8, kind: input, shape index: {}]   ;;  %s4117_s9 = inlined_call_operand.hbm [shape: f32[1,32], index: 9, kind: input, shape index: {}]   ;;  %s4118_s10 = inlined_call_operand.vmem [shape: bf16[32,64], index: 10, kind: input, shape index: {}]   ;;  %s4119_s11 = inlined_call_operand.hbm [shape: f32[1,64], index: 11, kind: input, shape index: {}]   ;;  %s4120_s12 = inlined_call_operand.hbm [shape: bf16[32,32], index: 12, kind: input, shape index: {}]   ;;  %s4121_s13 = inlined_call_operand.hbm [shape: f32[1,32], index: 13, kind: input, shape index: {}]   ;;  %s4122_s14 = inlined_call_operand.vmem [shape: bf16[32,64], index: 14, kind: input, shape index: {}]   ;;  %s4123_s15 = inlined_call_operand.vmem [shape: f32[1,64], index: 15, kind: input, shape index: {}]   ;;  %s4124_s16 = inlined_call_operand.vmem [shape: bf16[64,32], index: 16, kind: input, shape index: {}]   ;;  %s4125_s17 = inlined_call_operand.vmem [shape: f32[1,32], index: 17, kind: input, shape index: {}]   ;;  %s4126_s18 = inlined_call_operand.hbm [shape: f32[2,8,32], index: 18, kind: output, shape index: {}]  }
   0x1   :  { %4139 = sst [smem:[#allocation28_spill]] %s4108_s0 }
   0x2   :  { %4140 = sst [smem:[#allocation29_spill]] %s4109_s1 }
   0x3   :  { %4141 = sst [smem:[#allocation30_spill]] %s4110_s2 }
   0x4   :  { %4142 = sst [smem:[#allocation31_spill]] %s4112_s4 }
   0x5   :  { %4143 = sst [smem:[#allocation32_spill]] %s4113_s5 }
   0x6   :  { %4144 = sst [smem:[#allocation33_spill]] %s4114_s6 }
   0x7   :  { %4145 = sst [smem:[#allocation34_spill]] %s4115_s7 }
   0x8   :  { %4146 = sst [smem:[#allocation35_spill]] %s4116_s8 }
   0x9   :  { %4147 = sst [smem:[#allocation36_spill]] %s4117_s9 }
   0xa   :  { %4148 = sst [smem:[#allocation37_spill]] %s4118_s10 }
   0xb   :  { %4149 = sst [smem:[#allocation38_spill]] %s4119_s11 }
   0xc   :  { %4150 = sst [smem:[#allocation39_spill]] %s4122_s14 }
   0xd   :  { %4151 = sst [smem:[#allocation40_spill]] %s4123_s15 }
   0xe   :  { %4152 = sst [smem:[#allocation41_spill]] %s4124_s16 }
   0xf   :  { %4153 = sst [smem:[#allocation42_spill]] %s4125_s17 }
  0x10   :  { %4154 = sst [smem:[#allocation43_spill]] %s4126_s18 }
  0x11   :  { %23 = vsyncpa [#allocation3], 0 }
  0x12   :  { %25 = vsyncpa [#allocation3 + $0x1], 0 }
  0x13   :  { %26 = vsyncpa [#allocation6], 0 }
  0x14   :  { %28 = vsyncpa [#allocation6 + $0x1], 0 }
  0x15   :  { %29 = vsyncpa [#allocation9], 0 }
  0x16   :  { %30 = vsyncpa [#allocation12], 0 }
  0x17   :  { %31 = vsyncpa [#allocation15], 0 }
  0x18   :  { %32 = vsyncpa [#allocation18], 0 }
  0x19   :  { %33 = vsyncpa [#allocation4], 0 }
  0x1a   :  { %35 = vsyncpa [#allocation4 + $0x1], 0  ;;  %s3438_s27 = smov 0   ;;  %s3440_s28 = smov 0  }
  0x1b   :  { %s3442_s29 = smov 0   ;;  %s3444_s30 = smov 0  }
  0x1c LB: > { %s3314_s0 = smov [#allocation7]   ;;  %s3459_s1 = sadd.s32 4294967295, %s3312_s30   ;;  %s3312_s30 = sphi %s3444_s30, %s4201_s30   ;;  %s3308_s29 = sphi %s3442_s29, %s4200_s29   ;;  %s3304_s28 = sphi %s3440_s28, %s4199_s28   ;;  %s3300_s27 = sphi %s3438_s27, %s4198_s27  }
  0x1d   : > { %s482_s19 = sshll.u32 %s3314_s0, 4  ;;  %p2443_p0 = scmp.ge.s32.totalorder %s3312_s30, 1  ;;  %s3464_s19 = int_to_ptr.vmem [resolvable:$true] %s482_s19 }
  0x1e   : > { %p4132_p1 = scmp.eq.s32.totalorder %s3459_s1, 0  ;;  %p470_p2 = scmp.lt.s32.totalorder %s3312_s30, 3 }
  0x1f   : > { %s3315_s21 = smov [#allocation8]   ;;  %s3316_s23 = smov [#allocation11]  }
  0x20   : > { %p3466_p3 = pnand %p2443_p0, %p470_p2  ;;  %s498_s22 = sshll.u32 %s3315_s21, 4  ;;  %s3479_s22 = int_to_ptr.vmem [resolvable:$true] %s498_s22 }
  0x21   : > { %s522_s24 = sshll.u32 %s3316_s23, 4  ;;  %s4157_s4 = sld [smem:[#allocation31_spill]]  ;;  %s3481_s24 = int_to_ptr.vmem [resolvable:$true] %s522_s24 }
  0x22   : > { %s4155_s20 = scalar_select %p3466_p3, 1, 0 }
  0x23   : > { %p2772_p5 = pneg %p3466_p3 }
  0x25   : > { %p3475_p6 = pnand %p2772_p5, %p4132_p1 }
  0x27   : > { %s2938_s0 = scalar_lea.hbm %s4157_s4, 256  ;;  %p3491_p8 = pneg %p3475_p6 }
  0x28   : > { %p2939_p7 = scmp.ne.s32.totalorder %s4157_s4, %s2938_s0  ;;  %p2945_p11 = scmp.lt.u32.totalorder %s2938_s0, %s4157_s4 }
  0x2a   : > { %p2941_p9 = pnand %p3491_p8, %p2939_p7 }
  0x2c   : > { %p2942_p10 = pneg %p2941_p9 }
  0x2e   : > { %p2947_p12 = pnand %p2945_p11, %p2942_p10 }
  0x30   : > { %2950 = shalt.err (!%p2947_p12)
}
  0x31   : > { %s2951_s17 = scalar_lea.vmem %s3464_s19, 256  ;;  %p2959_p5 = scmp.lt.s32.totalorder %s3464_s19, %s3464_s19 }
  0x32   : > { %p2952_p13 = scmp.ne.s32.totalorder %s3464_s19, %s2951_s17  ;;  %p2960_p4 = scmp.lt.s32.totalorder %s2951_s17, %s2951_s17 }
  0x34   : > { %p2954_p0 = pnand %p2952_p13, %p3491_p8  ;;  %p2961_p7 = por %p2960_p4, %p2959_p5 }
  0x36   : > { %p2955_p2 = pneg %p2954_p0 }
  0x38   : > { %p2962_p9 = pnand %p2961_p7, %p2955_p2 }
  0x3a   : > { %2965 = shalt.err (!%p2962_p9)
}
  0x3b   : > { %s3317_s18 = smov 64   ;;  %s3318_s15 = smov 4  }
  0x3c   : > { %2775 = dma.hbm_to_vmem [thread:$0]  (!%p3475_p6), %s4157_s4, 256, %s3464_s19, [#allocation6], %s3317_s18, %s3317_s18, %s3318_s15  }
  0x3d   : > { %s4159_s6 = sld [smem:[#allocation33_spill]] }
  0x43   : > { %s2966_s17 = scalar_lea.hbm %s4159_s6, 256 }
  0x44   : > { %p2967_p4 = scmp.ne.s32.totalorder %s4159_s6, %s2966_s17  ;;  %p2973_p12 = scmp.lt.u32.totalorder %s2966_s17, %s4159_s6 }
  0x46   : > { %p2969_p10 = pnand %p2967_p4, %p3491_p8 }
  0x48   : > { %p2970_p11 = pneg %p2969_p10 }
  0x4a   : > { %p2975_p13 = pnand %p2973_p12, %p2970_p11 }
  0x4c   : > { %2978 = shalt.err (!%p2975_p13)
}
  0x4d   : > { %s2979_s19 = scalar_lea.vmem %s3479_s22, 256  ;;  %p2987_p7 = scmp.lt.s32.totalorder %s3479_s22, %s3479_s22 }
  0x4e   : > { %p2980_p0 = scmp.ne.s32.totalorder %s3479_s22, %s2979_s19  ;;  %p2988_p9 = scmp.lt.s32.totalorder %s2979_s19, %s2979_s19 }
  0x50   : > { %p2982_p2 = pnand %p2980_p0, %p3491_p8  ;;  %p2989_p4 = por %p2988_p9, %p2987_p7 }
  0x52   : > { %p2983_p5 = pneg %p2982_p2 }
  0x54   : > { %p2990_p10 = pnand %p2989_p4, %p2983_p5 }
  0x56   : > { %2993 = shalt.err (!%p2990_p10)
}
  0x57   : > { %2778 = dma.hbm_to_vmem [thread:$0]  (!%p3475_p6), %s4159_s6, 256, %s3479_s22, [#allocation9], %s3317_s18, %s3317_s18, %s3318_s15  }
  0x58   : > { %s4160_s8 = sld [smem:[#allocation35_spill]] }
  0x5e   : > { %s2994_s25 = scalar_lea.hbm %s4160_s8, 256 }
  0x5f   : > { %p2995_p11 = scmp.ne.s32.totalorder %s4160_s8, %s2994_s25  ;;  %p3001_p0 = scmp.lt.u32.totalorder %s2994_s25, %s4160_s8 }
  0x61   : > { %p2997_p12 = pnand %p2995_p11, %p3491_p8 }
  0x63   : > { %p2998_p13 = pneg %p2997_p12 }
  0x65   : > { %p3003_p2 = pnand %p3001_p0, %p2998_p13 }
  0x67   : > { %3006 = shalt.err (!%p3003_p2)
}
  0x68   : > { %s3007_s22 = scalar_lea.vmem %s3481_s24, 256  ;;  %p3015_p4 = scmp.lt.s32.totalorder %s3481_s24, %s3481_s24 }
  0x69   : > { %p3008_p5 = scmp.ne.s32.totalorder %s3481_s24, %s3007_s22  ;;  %p3016_p10 = scmp.lt.s32.totalorder %s3007_s22, %s3007_s22 }
  0x6b   : > { %p3010_p7 = pnand %p3008_p5, %p3491_p8  ;;  %p3017_p11 = por %p3016_p10, %p3015_p4 }
  0x6d   : > { %p3011_p9 = pneg %p3010_p7 }
  0x6f   : > { %p3018_p12 = pnand %p3017_p11, %p3011_p9 }
  0x71   : > { %3021 = shalt.err (!%p3018_p12)
}
  0x72   : > { %2784 = dma.hbm_to_vmem [thread:$0]  (!%p3475_p6), %s4160_s8, 256, %s3481_s24, [#allocation12], %s3317_s18, %s3317_s18, %s3318_s15  }
  0x73   : > { %s3319_s10 = smov [#allocation14]   ;;  %s3320_s16 = smov [#allocation10]  }
  0x74   : > { %s550_s14 = sshll.u32 %s3319_s10, 4  ;;  %s512_s25 = sshll.u32 %s3320_s16, 4  ;;  %s551_s14 = int_to_ptr.vmem [resolvable:$true] %s550_s14  ;;  %s513_s25 = int_to_ptr.vmem [resolvable:$true] %s512_s25 }
  0x75   : > { %s4161_s11 = sld [smem:[#allocation38_spill]] }
  0x7b   : > { %s3022_s23 = scalar_lea.hbm %s4161_s11, 16 }
  0x7c   : > { %p3023_p13 = scmp.ne.s32.totalorder %s4161_s11, %s3022_s23  ;;  %p3029_p5 = scmp.lt.u32.totalorder %s3022_s23, %s4161_s11 }
  0x7e   : > { %p3025_p0 = pnand %p3023_p13, %p3491_p8 }
  0x80   : > { %p3026_p2 = pneg %p3025_p0 }
  0x82   : > { %p3031_p7 = pnand %p3029_p5, %p3026_p2 }
  0x84   : > { %3034 = shalt.err (!%p3031_p7)
}
  0x85   : > { %s3035_s24 = scalar_lea.vmem %s551_s14, 16  ;;  %s3042_s5 = scalar_lea.vmem %s551_s14, 32 }
  0x86   : > { %p3036_p9 = scmp.ne.s32.totalorder %s551_s14, %s3035_s24  ;;  %p3043_p11 = scmp.lt.s32.totalorder %s551_s14, %s551_s14 }
  0x87   : > { %p3044_p12 = scmp.lt.s32.totalorder %s3042_s5, %s3035_s24 }
  0x88   : > { %p3038_p4 = pnand %p3036_p9, %p3491_p8 }
  0x89   : > { %p3045_p1 = por %p3044_p12, %p3043_p11 }
  0x8a   : > { %p3039_p10 = pneg %p3038_p4 }
  0x8c   : > { %p3046_p3 = pnand %p3045_p1, %p3039_p10 }
  0x8e   : > { %3049 = shalt.err (!%p3046_p3)
}
  0x8f   : > { %2790 = dma.hbm_to_vmem [thread:$0]  (!%p3475_p6), %s4161_s11, 16, %s551_s14, [#allocation15]  }
  0x90   : > { %s4162_s7 = sld [smem:[#allocation34_spill]] }
  0x96   : > { %s3050_s0 = scalar_lea.hbm %s4162_s7, 16 }
  0x97   : > { %p3051_p13 = scmp.ne.s32.totalorder %s4162_s7, %s3050_s0  ;;  %p3057_p3 = scmp.lt.u32.totalorder %s3050_s0, %s4162_s7 }
  0x99   : > { %p3053_p0 = pnand %p3051_p13, %p3491_p8 }
  0x9b   : > { %p3054_p1 = pneg %p3053_p0 }
  0x9d   : > { %p3059_p2 = pnand %p3057_p3, %p3054_p1 }
  0x9f   : > { %3062 = shalt.err (!%p3059_p2)
}
  0xa0   : > { %s3063_s24 = scalar_lea.vmem %s513_s25, 16  ;;  %s3070_s14 = scalar_lea.vmem %s513_s25, 32 }
  0xa1   : > { %p3064_p5 = scmp.ne.s32.totalorder %s513_s25, %s3063_s24  ;;  %p3071_p4 = scmp.lt.s32.totalorder %s513_s25, %s513_s25 }
  0xa2   : > { %p3072_p10 = scmp.lt.s32.totalorder %s3070_s14, %s3063_s24 }
  0xa3   : > { %p3066_p7 = pnand %p3064_p5, %p3491_p8 }
  0xa4   : > { %p3073_p11 = por %p3072_p10, %p3071_p4 }
  0xa5   : > { %p3067_p9 = pneg %p3066_p7 }
  0xa7   : > { %p3074_p12 = pnand %p3073_p11, %p3067_p9 }
  0xa9   : > { %3077 = shalt.err (!%p3074_p12)
}
  0xaa   : > { %2781 = dma.hbm_to_vmem [thread:$0]  (!%p3475_p6), %s4162_s7, 16, %s513_s25, [#allocation9]  }
  0xab   : > { %s3321_s16 = smov [#allocation13]   ;;  %s3322_s26 = smov [#allocation16]  }
  0xac   : > { %s536_s4 = sshll.u32 %s3321_s16, 4  ;;  %s560_s0 = sshll.u32 %s3322_s26, 4  ;;  %s537_s4 = int_to_ptr.vmem [resolvable:$true] %s536_s4  ;;  %s561_s0 = int_to_ptr.vmem [resolvable:$true] %s560_s0 }
  0xad   : > { %s4163_s9 = sld [smem:[#allocation36_spill]] }
  0xb3   : > { %s3078_s22 = scalar_lea.hbm %s4163_s9, 16 }
  0xb4   : > { %p3079_p13 = scmp.ne.s32.totalorder %s4163_s9, %s3078_s22  ;;  %p3085_p3 = scmp.lt.u32.totalorder %s3078_s22, %s4163_s9 }
  0xb6   : > { %p3081_p0 = pnand %p3079_p13, %p3491_p8 }
  0xb8   : > { %p3082_p1 = pneg %p3081_p0 }
  0xba   : > { %p3087_p2 = pnand %p3085_p3, %p3082_p1 }
  0xbc   : > { %3090 = shalt.err (!%p3087_p2)
}
  0xbd   : > { %s3091_s25 = scalar_lea.vmem %s537_s4, 16  ;;  %s3098_s10 = scalar_lea.vmem %s537_s4, 32 }
  0xbe   : > { %p3092_p5 = scmp.ne.s32.totalorder %s537_s4, %s3091_s25  ;;  %p3099_p4 = scmp.lt.s32.totalorder %s537_s4, %s537_s4 }
  0xbf   : > { %p3100_p10 = scmp.lt.s32.totalorder %s3098_s10, %s3091_s25 }
  0xc0   : > { %p3094_p7 = pnand %p3092_p5, %p3491_p8 }
  0xc1   : > { %p3101_p11 = por %p3100_p10, %p3099_p4 }
  0xc2   : > { %p3095_p9 = pneg %p3094_p7 }
  0xc4   : > { %p3102_p12 = pnand %p3101_p11, %p3095_p9 }
  0xc6   : > { %3105 = shalt.err (!%p3102_p12)
}
  0xc7   : > { %2787 = dma.hbm_to_vmem [thread:$0]  (!%p3475_p6), %s4163_s9, 16, %s537_s4, [#allocation12]  }
  0xc8   : > { %s3106_s22 = scalar_lea.hbm %s4120_s12, 256 }
  0xc9   : > { %p3107_p13 = scmp.ne.s32.totalorder %s4120_s12, %s3106_s22  ;;  %p3113_p3 = scmp.lt.u32.totalorder %s3106_s22, %s4120_s12 }
  0xcb   : > { %p3109_p0 = pnand %p3107_p13, %p3491_p8 }
  0xcd   : > { %p3110_p1 = pneg %p3109_p0 }
  0xcf   : > { %p3115_p2 = pnand %p3113_p3, %p3110_p1 }
  0xd1   : > { %3118 = shalt.err (!%p3115_p2)
}
  0xd2   : > { %s3119_s25 = scalar_lea.vmem %s561_s0, 256  ;;  %p3127_p4 = scmp.lt.s32.totalorder %s561_s0, %s561_s0 }
  0xd3   : > { %p3120_p5 = scmp.ne.s32.totalorder %s561_s0, %s3119_s25  ;;  %p3128_p10 = scmp.lt.s32.totalorder %s3119_s25, %s3119_s25 }
  0xd5   : > { %p3122_p7 = pnand %p3120_p5, %p3491_p8  ;;  %p3129_p11 = por %p3128_p10, %p3127_p4 }
  0xd7   : > { %p3123_p9 = pneg %p3122_p7 }
  0xd9   : > { %p3130_p12 = pnand %p3129_p11, %p3123_p9 }
  0xdb   : > { %3133 = shalt.err (!%p3130_p12)
}
  0xdc   : > { %2793 = dma.hbm_to_vmem [thread:$0]  (!%p3475_p6), %s4120_s12, 256, %s561_s0, [#allocation15], %s3317_s18, %s3317_s18, %s3318_s15  }
  0xdd   : > { %s3323_s16 = smov [#allocation17]   ;;  %s3134_s22 = scalar_lea.hbm %s4121_s13, 16 }
  0xde   : > { %s574_s26 = sshll.u32 %s3323_s16, 4  ;;  %p3135_p13 = scmp.ne.s32.totalorder %s4121_s13, %s3134_s22  ;;  %s575_s26 = int_to_ptr.vmem [resolvable:$true] %s574_s26 }
  0xdf   : > { %p3141_p3 = scmp.lt.u32.totalorder %s3134_s22, %s4121_s13 }
  0xe0   : > { %p3137_p0 = pnand %p3135_p13, %p3491_p8 }
  0xe2   : > { %p3138_p1 = pneg %p3137_p0 }
  0xe4   : > { %p3143_p2 = pnand %p3141_p3, %p3138_p1 }
  0xe6   : > { %3146 = shalt.err (!%p3143_p2)
}
  0xe7   : > { %s3147_s18 = scalar_lea.vmem %s575_s26, 16  ;;  %s3154_s15 = scalar_lea.vmem %s575_s26, 32 }
  0xe8   : > { %p3148_p5 = scmp.ne.s32.totalorder %s575_s26, %s3147_s18  ;;  %p3155_p4 = scmp.lt.s32.totalorder %s575_s26, %s575_s26 }
  0xe9   : > { %p3156_p10 = scmp.lt.s32.totalorder %s3154_s15, %s3147_s18 }
  0xea   : > { %p3150_p7 = pnand %p3148_p5, %p3491_p8 }
  0xeb   : > { %p3157_p11 = por %p3156_p10, %p3155_p4 }
  0xec   : > { %p3151_p9 = pneg %p3150_p7 }
  0xee   : > { %p3158_p12 = pnand %p3157_p11, %p3151_p9 }
  0xf0   : > { %3161 = shalt.err (!%p3158_p12)
}
  0xf1   : > { %2796 = dma.hbm_to_vmem [thread:$0]  (!%p3475_p6), %s4121_s13, 16, %s575_s26, [#allocation18]  }
  0xf2   : > { %s2442_s21 = sadd.s32 4294967294, %s3312_s30   ;;  %s3662_s2 = sadd.s32 1, %s3312_s30  }
  0xf3   : > { %s97_s4 = ssub.s32 %s3312_s30, %s3662_s2  ;;  %s100_s10 = sadd.s32 1, %s3308_s29 }
  0xf4   : > { %p98_p8 = scmp.eq.s32.totalorder %s97_s4, 0  ;;  %p107_p13 = scmp.ne.s32.totalorder %s3308_s29, %s3304_s28 }
  0xf5   : > { %p108_p0 = scmp.eq.s32.totalorder %s3312_s30, 0  ;;  %p113_p1 = scmp.ne.s32.totalorder %s3304_s28, %s3300_s27 }
  0xf6   : > { %s3673_s16 = scalar_select %p98_p8, %s3308_s29, %s100_s10  }
  0xf7   : > { %p3675_p3 = por %p108_p0, %p107_p13  ;;  %p4165_p2 = scmp.eq.s32.totalorder %s3459_s1, 0 }
  0xf8   : > { %p457_p5 = scmp.eq.s32.totalorder %s3459_s1, 1  ;;  %p463_p7 = scmp.eq.s32.totalorder %s2442_s21, 1 }
  0xf9   : > { %p3681_p6 = por %p4165_p2, %p113_p1  ;;  %p2816_p9 = scmp.lt.s32.totalorder %s3312_s30, 2 }
  0xfa   : > { %s612_s17 = sand.u32 1, %s3308_s29   ;;  %p3688_p4 = por %p457_p5, %p107_p13 }
  0xfb   : > { %s4166_s26 = scalar_select %p3681_p6, 1, 0 }
  0xfc   : > { %s4167_s22 = scalar_select %p3688_p4, 1, 0 }
  0xfd   : > { %p3692_p10 = por %p463_p7, %p113_p1  ;;  %s3696_s24 = sshll.u32 %s612_s17, 1 }
  0xfe   : > { %s2454_s14 = sshll.u32 %s3312_s30, 5  ;;  %s4169_s15 = sld [smem:[#allocation30_spill]] }
  0xff   : > { %s4168_s19 = scalar_select %p3692_p10, 1, 0 }
 0x100   : > { %s616_s25 = scalar_lea.vmem [#allocation2], %s3696_s24  ;;  %p3709_p11 = pnand %p2816_p9, %p3675_p3 }
 0x101   : > { %s623_s21 = sshll.u32 %s616_s25, 4  ;;  %s3716_s5 = scalar_lea.hbm %s4111_s3, %s2454_s14  ;;  %s3705_s21 = int_to_ptr.vmem [resolvable:$true] %s623_s21 }
 0x102   : > { %s630_s18 = sand.u32 1, %s3312_s30   ;;  %s613_s7 = scalar_lea.sflag [#allocation3], %s612_s17 }
 0x103   : > { %p3164_p8 = pneg %p3709_p11 }
 0x104   : > { %s3702_s0 = scalar_lea.hbm %s4169_s15, %s2454_s14  ;;  %s3167_s9 = scalar_lea.hbm %s4169_s15, 64 }
 0x105   : > { %s3162_s8 = scalar_lea.hbm %s3702_s0, 32  ;;  %p3168_p1 = scmp.lt.u32.totalorder %s3702_s0, %s4169_s15 }
 0x106   : > { %p3163_p12 = scmp.ne.s32.totalorder %s3702_s0, %s3162_s8  ;;  %p3169_p3 = scmp.lt.u32.totalorder %s3167_s9, %s3162_s8 }
 0x107   : > { %p3171_p5 = scmp.lt.u32.totalorder %s3162_s8, %s3702_s0 }
 0x108   : > { %p3165_p13 = pnand %p3164_p8, %p3163_p12  ;;  %p3170_p2 = por %p3169_p3, %p3168_p1 }
 0x10a   : > { %p3166_p0 = pneg %p3165_p13  ;;  %p3172_p7 = por %p3171_p5, %p3170_p2 }
 0x10c   : > { %p3173_p9 = pnand %p3172_p7, %p3166_p0 }
 0x10e   : > { %3176 = shalt.err (!%p3173_p9)
}
 0x10f   : > { %s3177_s17 = scalar_lea.vmem %s3705_s21, 32  ;;  %s3324_s14 = smov [#allocation2]  }
 0x110   : > { %p3178_p12 = scmp.ne.s32.totalorder %s3705_s21, %s3177_s17  ;;  %s3182_s10 = sshll.u32 %s3324_s14, 4  ;;  %s3183_s10 = int_to_ptr.vmem [resolvable:$false] %s3182_s10 }
 0x111   : > { %s3184_s11 = scalar_lea.vmem %s3183_s10, 64  ;;  %p3185_p4 = scmp.lt.s32.totalorder %s3705_s21, %s3183_s10 }
 0x112   : > { %p3180_p13 = pnand %p3178_p12, %p3164_p8  ;;  %p3186_p1 = scmp.lt.s32.totalorder %s3184_s11, %s3177_s17 }
 0x114   : > { %p3181_p10 = pneg %p3180_p13  ;;  %p3187_p3 = por %p3186_p1, %p3185_p4 }
 0x116   : > { %p3188_p2 = pnand %p3187_p3, %p3181_p10 }
 0x118   : > { %3191 = shalt.err (!%p3188_p2)
}
 0x119   : > { %2800 = dma.hbm_to_vmem [thread:$0]  (!%p3709_p11), %s3702_s0, 32, %s3705_s21, %s613_s7  }
 0x11a   : > { %s634_s8 = scalar_lea.vmem [#allocation5], %s3696_s24  ;;  %s631_s23 = scalar_lea.sflag [#allocation6], %s630_s18 }
 0x11b   : > { %s641_s9 = sshll.u32 %s634_s8, 4  ;;  %s3192_s25 = scalar_lea.hbm %s3716_s5, 32  ;;  %s642_s9 = int_to_ptr.vmem [resolvable:$true] %s641_s9 }
 0x11c   : > { %p3193_p4 = scmp.ne.s32.totalorder %s3716_s5, %s3192_s25  ;;  %s3197_s14 = scalar_lea.hbm %s4111_s3, 64 }
 0x11d   : > { %p3198_p5 = scmp.lt.u32.totalorder %s3716_s5, %s4111_s3  ;;  %p3199_p7 = scmp.lt.u32.totalorder %s3197_s14, %s3192_s25 }
 0x11e   : > { %p3195_p10 = pnand %p3193_p4, %p3164_p8  ;;  %p3201_p12 = scmp.lt.u32.totalorder %s3192_s25, %s3716_s5 }
 0x11f   : > { %p3200_p9 = por %p3199_p7, %p3198_p5 }
 0x120   : > { %p3196_p0 = pneg %p3195_p10 }
 0x121   : > { %p3202_p13 = por %p3201_p12, %p3200_p9 }
 0x123   : > { %p3203_p1 = pnand %p3202_p13, %p3196_p0 }
 0x125   : > { %3206 = shalt.err (!%p3203_p1)
}
 0x126   : > { %s3207_s7 = scalar_lea.vmem %s642_s9, 32  ;;  %s3325_s24 = smov [#allocation5]  }
 0x127   : > { %p3208_p3 = scmp.ne.s32.totalorder %s642_s9, %s3207_s7  ;;  %s3212_s0 = sshll.u32 %s3325_s24, 4  ;;  %s3213_s0 = int_to_ptr.vmem [resolvable:$false] %s3212_s0 }
 0x128   : > { %s3214_s21 = scalar_lea.vmem %s3213_s0, 64  ;;  %p3215_p10 = scmp.lt.s32.totalorder %s642_s9, %s3213_s0 }
 0x129   : > { %p3210_p2 = pnand %p3208_p3, %p3164_p8  ;;  %p3216_p6 = scmp.lt.s32.totalorder %s3214_s21, %s3207_s7 }
 0x12b   : > { %p3211_p4 = pneg %p3210_p2  ;;  %p3217_p5 = por %p3216_p6, %p3215_p10 }
 0x12d   : > { %p3218_p7 = pnand %p3217_p5, %p3211_p4 }
 0x12f   : > { %3221 = shalt.err (!%p3218_p7)
}
 0x130   : > { %2803 = dma.hbm_to_vmem [thread:$0]  (!%p3709_p11), %s3716_s5, 32, %s642_s9, %s631_s23  }
 0x131   : > { %p4171_p0 = scmp.ne.s32.totalorder %s4155_s20, 0 }
 0x132   : > { %s3769_s18 = sand.u32 (!%p4171_p0), 1, %s3304_s28   ;;  %p4172_p6 = scmp.ne.s32.totalorder (!%p4171_p0), %s4166_s26, 0 }
 0x133   : > { %650 = sbr.rel (%p4171_p0) target bundleno = 4657 (0x1231), region = 92  ;;  %s2458_s8 = sshll.u32 (!%p4171_p0), %s3769_s18, 1 }
 0x134   : > { %s653_s25 = scalar_lea.sflag (!%p4171_p0), [#allocation3], %s3769_s18  ;;  %s3773_s6 = scalar_lea.vmem (!%p4171_p0), [#allocation2], %s2458_s8 }
 0x13a   : > { %3267 = dma.done.wait (%p4172_p6), %s653_s25, 32  }
 0x13b   : > { %3269 = vsyncadd (%p4172_p6), %s653_s25, 4294967264  ;;  %s661_s4 = sand.u32 1, %s3459_s1   ;;  %s3780_s5 = scalar_lea.vmem [#allocation5], %s2458_s8 }
 0x13c   : > { %s662_s20 = scalar_lea.sflag [#allocation6], %s661_s4 }
 0x13d   : > { %3271 = dma.done.wait (%p4172_p6), %s662_s20, 32  }
 0x13e   : > { %3273 = vsyncadd (%p4172_p6), %s662_s20, 4294967264  ;;  %p4173_p11 = scmp.eq.s32.totalorder %s3459_s1, 0 }
 0x140   : > { %3275 = dma.done.wait (%p4173_p11), [#allocation6], 256   ;;  %p4174_p8 = pmov %p4173_p11 }
 0x142   : > { %3277 = vsyncadd (%p4174_p8), [#allocation6], 4294967040  ;;  %p4175_p9 = pmov %p4174_p8 }
 0x143   : > { %p4176_p12 = pmov %p4174_p8 }
 0x144   : > { %3279 = dma.done.wait (%p4175_p9), [#allocation9], 272  }
 0x145   : > { %3281 = vsyncadd (%p4176_p12), [#allocation9], 4294967024  ;;  %p4177_p13 = pmov %p4174_p8 }
 0x146   : > { %p4178_p1 = pmov %p4174_p8 }
 0x147   : > { %3283 = dma.done.wait (%p4177_p13), [#allocation12], 272  }
 0x148   : > { %3285 = vsyncadd (%p4178_p1), [#allocation12], 4294967024  ;;  %p4179_p3 = pmov %p4178_p1 }
 0x149   : > { %p4180_p2 = pmov %p4178_p1 }
 0x14a   : > { %3287 = dma.done.wait (%p4179_p3), [#allocation15], 272  }
 0x14b   : > { %3289 = vsyncadd (%p4180_p2), [#allocation15], 4294967024  ;;  %p4181_p4 = pmov %p4178_p1 }
 0x14c   : > { %p4182_p10 = pmov %p4178_p1 }
 0x14d   : > { %3291 = dma.done.wait (%p4181_p4), [#allocation18], 16  }
 0x14e   : > { %3293 = vsyncadd (%p4182_p10), [#allocation18], 4294967280  ;;  %p764_p5 = scmp.lt.s32.totalorder %s3459_s1, 1  ;;  %s4183_s14 = sld [smem:[#allocation28_spill]]  ;;  %vm775_vm0 = vcmask 261120   ;;  %v2884_v7 = vld [vmem:[#allocation7] sm:$0xff]  }
 0x14f   : > { %v3326_v8 = vmov 0.0   ;;  %vm3327_vm1 = vmmov 0   ;;  %v2885_v9 = vld [vmem:[#allocation7 + $0x8] sm:$0xff]   ;;  %s4184_s24 = sld [smem:[#allocation32_spill]]  ;;  %s3328_s0 = smov 120   ;;  %vm866_vm2 = vcmask 64512  }
 0x150   : > { %s3808_s26 = scalar_select %p764_p5, %s3459_s1, 1  ;;  %2578 = vmatprep.subr.bf16.mxu1 %v3326_v8  ;;  %2582 = vmatprep.mubr.msk.bf16.mxu1 %vm3327_vm1, %v3326_v8  ;;  %v858_v34 = vld [vmem:[%s3773_s6] sm:$0x3]  ;;  %vm931_vm4 = vcmask 1043456   ;;  %vm1321_vm5 = vcmask 130048   ;;  %vm1323_vm6 = vcmask 195584  }
 0x151   : > { %2579 = vmatpush3.bf16.msra.mxu1 %v2884_v7  ;;  %2592 = vmatprep.subr.bf16.mxu0 %v3326_v8  ;;  %s3329_s21 = smov 96   ;;  %s3330_s8 = smov 88   ;;  %v859_v35 = vunpack.c.0.s8 %v858_v34  ;;  %vm2189_vm8 = vcmask 523264  }
 0x152   : > { %s2469_s9 = sshll.u32 %s3808_s26, 3  ;;  %2580 = vmatprep.subr.bf16.mxu1 %v3326_v8  ;;  %2594 = vmatprep.mubr.msk.bf16.mxu0 %vm3327_vm1, %v3326_v8  ;;  %s3331_s25 = smov 80  }
 0x153   : > { %s3332_s4 = smov 112   ;;  %s3333_s20 = smov 72   ;;  %v860_v36 = vcvt.s32.f32 %v859_v35 }
 0x154   : > { %s767_s10 = scalar_lea.vmem %s4183_s14, %s2469_s9  ;;  %s3334_s9 = smov 104  }
 0x155   : > { %v3814_v0 = vld [vmem:[%s767_s10] sm:$0xff]  ;;  %2581 = vmatpush3.bf16.msra.mxu1 %v2885_v9  ;;  %vm861_vm3 = vcmp.eq.f32.partialorder %v860_v36, 0.0  ;;  %s3335_s6 = smov 64   ;;  %s3336_s23 = smov 56  }
 0x156   : > { %v776_v1 = vsel %vm775_vm0, %v3814_v0, 0.0  ;;  %2586 = vmatprep.subr.bf16.mxu1 %v3326_v8  ;;  %v2475_v16 = vld [vmem:[%s4184_s24] ss:$0 sm:$0xff]  ;;  %s3337_s17 = smov 48   ;;  %s3338_s14 = smov 40  }
 0x157   : > { %777 = vadd.xlane.f32.xlu0 %v776_v1  ;;  %s4138_s10 = smov 8   ;;  %s4137_s11 = smov 16  }
 0x158   : > { %s4136_s7 = smov 24   ;;  %p4195_p0 = scmp.ne.s32.totalorder %s4167_s22, 0 }
 0x1e4   : > { %v778_v2 = vpop.xlane.xlu0 %777 }
 0x1e5   : > { %v780_v3 = vmul.f32 0.03125, %v778_v2 }
 0x1e7   : > { %v781_v4 = vsub.f32 %v3814_v0, %v780_v3 }
 0x1e9   : > { %v782_v5 = vmul.f32 %v781_v4, %v781_v4 }
 0x1eb   : > { %v783_v6 = vsel %vm775_vm0, %v782_v5, 0.0 }
 0x1ec   : > { %784 = vadd.xlane.f32.xlu0 %v783_v6 }
 0x279   : > { %v785_v10 = vpop.xlane.xlu0 %784 }
 0x27a   : > { %v786_v11 = vmul.f32 0.032258064, %v785_v10 }
 0x27c   : > { %2900 = vrsqrt.f32 %v786_v11 }
 0x286   : > { %v2901_v12 = vpop.eup %2900 }
 0x287   : > { %v788_v13 = vmul.f32 %v2901_v12, %v781_v4 }
 0x289   : > { %v789_v14 = vpack.c.bf16 %v788_v13, %v788_v13 }
 0x28b   : > { %2583 = vmatmul.mubr.msk.bf16.vlgmr.msra.gmra.mrb[0].mxu1 %vm775_vm0, %v789_v14 }
 0x28c   : > { %2588 = vmatprep.mubr.msk.bf16.mxu1 %vm3327_vm1, %v3326_v8 }
 0x35e   : > { %v843_v15 = vpop.f32.mrb[0].mxu1 }
 0x35f   : > { %v849_v17 = vmul.f32 1000000.0, %v843_v15  ;;  %v2584_v18 = vpop.f32.mrb[1].mxu1 }
 0x360   : > { %v846_v19 = vpop.f32.mrb[2].mxu1 }
 0x361   : > { %v857_v20 = vadd.f32 %v2475_v16, %v849_v17  ;;  %v2585_v21 = vpop.f32.mrb[3].mxu1 }
 0x363   : > { %v3834_v22 = vpack.c.bf16 %v857_v20, %v857_v20 }
 0x365   : > { %975 = vrot.lane.b32.xlu0 %v3834_v22, %s3328_s0  ;;  %864 = vrot.lane.b32.xlu1 %v3834_v22, %s3329_s21 }
 0x369   : > { %977 = vrot.lane.b32.xlu1 %v3834_v22, %s3330_s8 }
 0x36d   : > { %1088 = vrot.lane.b32.xlu1 %v3834_v22, %s3331_s25 }
 0x371   : > { %1086 = vrot.lane.b32.xlu1 %v3834_v22, %s3332_s4 }
 0x375   : > { %1199 = vrot.lane.b32.xlu1 %v3834_v22, %s3333_s20 }
 0x379   : > { %1197 = vrot.lane.b32.xlu1 %v3834_v22, %s3334_s9 }
 0x3d7   : > { %v865_v23 = vpop.permute.xlu1 %864  ;;  %v976_v28 = vpop.permute.xlu0 %975 }
 0x3d8   : > { %v871_v24 = vsel %vm866_vm2, %v865_v23, 0 }
 0x3d9   : > { %2587 = vmatpush3.bf16.xpose.msra.mxu1 %v871_v24 }
 0x3da   : > { %2598 = vmatprep.subr.bf16.mxu1 %v3326_v8 }
 0x3db   : > { %v978_v25 = vpop.permute.xlu1 %977 }
 0x3dc   : > { %v983_v26 = vsel %vm866_vm2, %v978_v25, 0 }
 0x3df   : > { %v1089_v27 = vpop.permute.xlu1 %1088 }
 0x3e0   : > { %2589 = vmatmul.mubr.msk.bf16.vlgmr.msra.gmra.mrb[4].mxu1 %vm866_vm2, %v3834_v22  ;;  %v1094_v30 = vsel %vm866_vm2, %v1089_v27, 0 }
 0x3e1   : > { %2599 = vmatpush3.bf16.xpose.msra.mxu1 %v983_v26  ;;  %2600 = vmatprep.mubr.msk.bf16.mxu1 %vm3327_vm1, %v3326_v8 }
 0x3e2   : > { %2610 = vmatprep.subr.bf16.mxu1 %v3326_v8 }
 0x3e3   : > { %v1087_v29 = vpop.permute.xlu1 %1086 }
 0x3e7   : > { %v1200_v31 = vpop.permute.xlu1 %1199 }
 0x3e8   : > { %2601 = vmatmul.mubr.msk.bf16.vlgmr.msra.gmra.mrb[8].mxu1 %vm866_vm2, %v976_v28  ;;  %v1205_v32 = vsel %vm866_vm2, %v1200_v31, 0 }
 0x3e9   : > { %2611 = vmatpush3.bf16.xpose.msra.mxu1 %v1094_v30  ;;  %2612 = vmatprep.mubr.msk.bf16.mxu1 %vm3327_vm1, %v3326_v8 }
 0x3ea   : > { %2622 = vmatprep.subr.bf16.mxu1 %v3326_v8 }
 0x3eb   : > { %v1198_v33 = vpop.permute.xlu1 %1197 }
 0x3f0   : > { %2613 = vmatmul.mubr.msk.bf16.vlgmr.msra.gmra.mrb[12].mxu1 %vm866_vm2, %v1087_v29 }
 0x3f1   : > { %2623 = vmatpush3.bf16.xpose.msra.mxu1 %v1205_v32  ;;  %2624 = vmatprep.mubr.msk.bf16.mxu1 %vm3327_vm1, %v3326_v8 }
 0x3f2   : > { %2634 = vmatprep.subr.bf16.mxu1 %v3326_v8 }
 0x3f8   : > { %2625 = vmatmul.mubr.msk.bf16.vlgmr.msra.gmra.mrb[16].mxu1 %vm866_vm2, %v1198_v33 }
 0x3f9   : > { %2638 = vmatprep.mubr.msk.bf16.mxu1 %vm3327_vm1, %v3326_v8 }
 0x4b3   : > { %v907_v37 = vpop.f32.mrb[4].mxu1 }
 0x4b4   : > { %v913_v38 = vsel %vm861_vm3, -1e+09, %v907_v37  ;;  %v2590_v39 = vpop.f32.mrb[5].mxu1 }
 0x4b5   : > { %v910_v40 = vpop.f32.mrb[6].mxu1  ;;  %v914_v41 = vsel %vm866_vm2, %v913_v38, -inf }
 0x4b6   : > { %915 = vmax.xlane.f32.xlu1 %v914_v41  ;;  %v2591_v42 = vpop.f32.mrb[7].mxu1 }
 0x4bb   : > { %v1019_v43 = vpop.f32.mrb[8].mxu1 }
 0x4bc   : > { %v1025_v44 = vsel %vm861_vm3, -1e+09, %v1019_v43  ;;  %v2602_v45 = vpop.f32.mrb[9].mxu1 }
 0x4bd   : > { %v1022_v46 = vpop.f32.mrb[10].mxu1  ;;  %v1026_v47 = vsel %vm866_vm2, %v1025_v44, -inf }
 0x4be   : > { %1027 = vmax.xlane.f32.xlu0 %v1026_v47  ;;  %v2603_v48 = vpop.f32.mrb[11].mxu1 }
 0x4c3   : > { %v1130_v49 = vpop.f32.mrb[12].mxu1 }
 0x4c4   : > { %v1136_v50 = vsel %vm861_vm3, -1e+09, %v1130_v49  ;;  %v2614_v51 = vpop.f32.mrb[13].mxu1 }
 0x4c5   : > { %v1133_v52 = vpop.f32.mrb[14].mxu1  ;;  %v1137_v53 = vsel %vm866_vm2, %v1136_v50, -inf  ;;  %v2886_v51 = vld [vmem:[#allocation8] sm:$0xff]  }
 0x4c6   : > { %1138 = vmax.xlane.f32.xlu1 %v1137_v53  ;;  %v2615_v54 = vpop.f32.mrb[15].mxu1  ;;  %2635 = vmatpush3.bf16.msra.mxu1 %v2886_v51  ;;  %v2887_v52 = vld [vmem:[#allocation8 + $0x8] sm:$0xff]  }
 0x4c7   : > { %2636 = vmatprep.subr.bf16.mxu1 %v3326_v8 }
 0x4ca   : > { %2637 = vmatpush3.bf16.msra.mxu1 %v2887_v52 }
 0x4cb   : > { %v1241_v55 = vpop.f32.mrb[16].mxu1  ;;  %2650 = vmatprep.subr.bf16.mxu1 %v3326_v8 }
 0x4cc   : > { %v1247_v56 = vsel %vm861_vm3, -1e+09, %v1241_v55  ;;  %v2626_v57 = vpop.f32.mrb[17].mxu1 }
 0x4cd   : > { %v1244_v58 = vpop.f32.mrb[18].mxu1  ;;  %v1248_v59 = vsel %vm866_vm2, %v1247_v56, -inf }
 0x4ce   : > { %1249 = vmax.xlane.f32.xlu0 %v1248_v59  ;;  %v2627_v60 = vpop.f32.mrb[19].mxu1 }
 0x543   : > { %v916_v61 = vpop.xlane.xlu1 %915 }
 0x544   : > { %v917_v62 = vsub.f32 %v913_v38, %v916_v61 }
 0x546   : > { %v918_v63 = vmul.f32 1.442695, %v917_v62 }
 0x548   : > { %2902 = vpow2.f32 %v918_v63 }
 0x54b   : > { %v1028_v1 = vpop.xlane.xlu0 %1027 }
 0x54c   : > { %v1029_v2 = vsub.f32 %v1025_v44, %v1028_v1 }
 0x54e   : > { %v1030_v3 = vmul.f32 1.442695, %v1029_v2 }
 0x550   : > { %2904 = vpow2.f32 %v1030_v3 }
 0x552   : > { %v2903_v4 = vpop.eup %2902 }
 0x553   : > { %v920_v5 = vsel %vm866_vm2, %v2903_v4, 0.0  ;;  %v1139_v14 = vpop.xlane.xlu1 %1138 }
 0x554   : > { %921 = vadd.xlane.f32.xlu1 %v920_v5  ;;  %v1140_v15 = vsub.f32 %v1136_v50, %v1139_v14  ;;  %v2484_v5 = vld [vmem:[#allocation10] ss:$0 sm:$0xff] }
 0x556   : > { %v1141_v16 = vmul.f32 1.442695, %v1140_v15 }
 0x55a   : > { %v2905_v6 = vpop.eup %2904 }
 0x55b   : > { %v1250_v7 = vpop.xlane.xlu0 %1249  ;;  %v1032_v9 = vsel %vm866_vm2, %v2905_v6, 0.0 }
 0x55c   : > { %v1251_v10 = vsub.f32 %v1247_v56, %v1250_v7  ;;  %1033 = vadd.xlane.f32.xlu0 %v1032_v9 }
 0x55e   : > { %v1252_v11 = vmul.f32 1.442695, %v1251_v10 }
 0x560   : > { %2906 = vpow2.f32 %v1252_v11 }
 0x561   : > { %2908 = vpow2.f32 %v1141_v16 }
 0x565   : > { %926 = vrot.lane.b32.xlu1 %v3834_v22, %s3335_s6  ;;  %s4194_s6 = sld [smem:[#allocation43_spill]] }
 0x56a   : > { %v2907_v12 = vpop.eup %2906 }
 0x56b   : > { %v1254_v13 = vsel %vm866_vm2, %v2907_v12, 0.0  ;;  %v2909_v17 = vpop.eup %2908 }
 0x56c   : > { %1255 = vadd.xlane.f32.xlu0 %v1254_v13  ;;  %v1143_v18 = vsel %vm866_vm2, %v2909_v17, 0.0 }
 0x582   : > { %1038 = vrot.lane.b32.xlu0 %v3834_v22, %s3336_s23  ;;  %s4185_s23 = sld [smem:[#allocation37_spill]] }
 0x588   : > { %v2888_v14 = vld [vmem:[%s4185_s23] sm:$0xff]  }
 0x589   : > { %1144 = vadd.xlane.f32.xlu1 %v1143_v18 }
 0x59a   : > { %1149 = vrot.lane.b32.xlu1 %v3834_v22, %s3337_s17  ;;  %s2522_s17 = sshll.u32 %s3808_s26, 4  ;;  %s4188_s26 = smov 16  }
 0x59e   : > { %1260 = vrot.lane.b32.xlu1 %v3834_v22, %s3338_s14 }
 0x5e1   : > { %v922_v19 = vpop.xlane.xlu1 %921 }
 0x5e2   : > { %2910 = vrcp.f32 %v922_v19 }
 0x5e5   : > { %v927_v20 = vpop.permute.xlu1 %926 }
 0x5e6   : > { %v933_v21 = vsel %vm931_vm4, %v927_v20, 0 }
 0x5e7   : > { %2593 = vmatpush3.bf16.msra.mxu0 %v933_v21  ;;  %v2889_v21 = vld [vmem:[%s4185_s23 + $0x8] sm:$0xff]  }
 0x5e8   : > { %2604 = vmatprep.subr.bf16.mxu0 %v3326_v8 }
 0x5e9   : > { %v1034_v24 = vpop.xlane.xlu0 %1033 }
 0x5ea   : > { %2912 = vrcp.f32 %v1034_v24  ;;  %v2890_v24 = vld [vmem:[#allocation11] sm:$0xff]  }
 0x5ec   : > { %v2911_v23 = vpop.eup %2910 }
 0x5ed   : > { %v924_v25 = vmul.f32 %v2911_v23, %v2903_v4 }
 0x5ef   : > { %v925_v26 = vpack.c.bf16 %v924_v25, %v924_v25  ;;  %v2891_v25 = vld [vmem:[#allocation11 + $0x8] sm:$0xff]  }
 0x5f1   : > { %2595 = vmatmul.mubr.msk.bf16.vlgmr.msra.gmra.mrb[0].mxu0 %vm866_vm2, %v925_v26 }
 0x5f2   : > { %2606 = vmatprep.mubr.msk.bf16.mxu0 %vm3327_vm1, %v3326_v8 }
 0x5f4   : > { %v2913_v22 = vpop.eup %2912 }
 0x5f5   : > { %v1036_v28 = vmul.f32 %v2913_v22, %v2905_v6 }
 0x5f7   : > { %v1037_v31 = vpack.c.bf16 %v1036_v28, %v1036_v28 }
 0x5f9   : > { %v1256_v27 = vpop.xlane.xlu0 %1255 }
 0x5fd   : > { %v1039_v29 = vpop.permute.xlu0 %1038 }
 0x5fe   : > { %v1044_v30 = vsel %vm931_vm4, %v1039_v29, 0 }
 0x5ff   : > { %2605 = vmatpush3.bf16.msra.mxu0 %v1044_v30  ;;  %v2492_v30 = vld [vmem:[#allocation14] ss:$0 sm:$0xff] }
 0x600   : > { %2616 = vmatprep.subr.bf16.mxu0 %v3326_v8 }
 0x602   : > { %2607 = vmatmul.mubr.msk.bf16.vlgmr.msra.gmra.mrb[4].mxu0 %vm866_vm2, %v1037_v31 }
 0x603   : > { %2618 = vmatprep.mubr.msk.bf16.mxu0 %vm3327_vm1, %v3326_v8 }
 0x616   : > { %v1145_v32 = vpop.xlane.xlu1 %1144 }
 0x617   : > { %2914 = vrcp.f32 %v1145_v32 }
 0x618   : > { %2916 = vrcp.f32 %v1256_v27 }
 0x61a   : > { %v1150_v33 = vpop.permute.xlu1 %1149 }
 0x61b   : > { %v1155_v34 = vsel %vm931_vm4, %v1150_v33, 0 }
 0x61c   : > { %2617 = vmatpush3.bf16.msra.mxu0 %v1155_v34 }
 0x61d   : > { %2628 = vmatprep.subr.bf16.mxu0 %v3326_v8 }
 0x61e   : > { %v1261_v37 = vpop.permute.xlu1 %1260 }
 0x61f   : > { %v1266_v40 = vsel %vm931_vm4, %v1261_v37, 0 }
 0x621   : > { %v2915_v35 = vpop.eup %2914 }
 0x622   : > { %v1147_v36 = vmul.f32 %v2915_v35, %v2909_v17  ;;  %v2917_v39 = vpop.eup %2916 }
 0x623   : > { %v1258_v41 = vmul.f32 %v2917_v39, %v2907_v12 }
 0x624   : > { %v1148_v38 = vpack.c.bf16 %v1147_v36, %v1147_v36 }
 0x625   : > { %v1259_v42 = vpack.c.bf16 %v1258_v41, %v1258_v41 }
 0x626   : > { %2619 = vmatmul.mubr.msk.bf16.vlgmr.msra.gmra.mrb[8].mxu0 %vm866_vm2, %v1148_v38 }
 0x627   : > { %2629 = vmatpush3.bf16.msra.mxu0 %v1266_v40  ;;  %2630 = vmatprep.mubr.msk.bf16.mxu0 %vm3327_vm1, %v3326_v8  ;;  %v2491_v40 = vld [vmem:[#allocation13] ss:$0 sm:$0xff] }
 0x628   : > { %2642 = vmatprep.subr.bf16.mxu0 %v3326_v8 }
 0x62e   : > { %2631 = vmatmul.mubr.msk.bf16.vlgmr.msra.gmra.mrb[12].mxu0 %vm866_vm2, %v1259_v42 }
 0x62f   : > { %2646 = vmatprep.mubr.msk.bf16.mxu0 %vm3327_vm1, %v3326_v8  ;;  %2643 = vmatpush3.bf16.msra.mxu0 %v2890_v24 }
 0x630   : > { %2644 = vmatprep.subr.bf16.mxu0 %v3326_v8 }
 0x633   : > { %2645 = vmatpush3.bf16.msra.mxu0 %v2891_v25 }
 0x634   : > { %2658 = vmatprep.subr.bf16.mxu0 %v3326_v8 }
 0x6c4   : > { %v969_v43 = vpop.f32.mrb[0].mxu0 }
 0x6c5   : > { %v2596_v44 = vpop.f32.mrb[1].mxu0 }
 0x6c6   : > { %v972_v45 = vpop.f32.mrb[2].mxu0 }
 0x6c7   : > { %v2597_v46 = vpop.f32.mrb[3].mxu0 }
 0x6d5   : > { %v1080_v47 = vpop.f32.mrb[4].mxu0 }
 0x6d6   : > { %1309 = vrot.lane.b32.xlu0 %v1080_v47, %s4138_s10  ;;  %v2608_v48 = vpop.f32.mrb[5].mxu0 }
 0x6d7   : > { %v1083_v49 = vpop.f32.mrb[6].mxu0 }
 0x6d8   : > { %v2609_v50 = vpop.f32.mrb[7].mxu0 }
 0x6f9   : > { %v1191_v53 = vpop.f32.mrb[8].mxu0 }
 0x6fa   : > { %1313 = vrot.lane.b32.xlu1 %v1191_v53, %s4137_s11  ;;  %v2620_v54 = vpop.f32.mrb[9].mxu0  ;;  %s4186_s11 = sld [smem:[#allocation29_spill]] }
 0x6fb   : > { %v1194_v55 = vpop.f32.mrb[10].mxu0 }
 0x6fc   : > { %v2621_v56 = vpop.f32.mrb[11].mxu0 }
 0x6fd   : > { %v1544_v56 = vld [vmem:[%s3780_s5] sm:$0x3]  ;;  %s4187_s5 = smov 8  }
 0x700   : > { %s772_s10 = scalar_lea.vmem %s4186_s11, %s2522_s17  ;;  %s4191_s11 = sld [smem:[#allocation41_spill]] }
 0x701   : > { %v1302_v57 = vpop.f32.mrb[12].mxu0  ;;  %v1474_v19 = vld [vmem:[%s772_s10] sm:$0xff]  ;;  %v1475_v20 = vld [vmem:[%s772_s10 + $0x8] sm:$0xff]  ;;  %s2519_s10 = sshll.u32 %s3459_s1, 7  ;;  %s2236_s1 = scalar_lea.sflag [#allocation4], %s3769_s18 }
 0x702   : > { %1317 = vrot.lane.b32.xlu0 %v1302_v57, %s4136_s7  ;;  %v2632_v58 = vpop.f32.mrb[13].mxu0  ;;  %v1476_v23 = vpack.c.bf16 %v1475_v20, %v1474_v19  ;;  %v1545_v57 = vunpack.c.0.s8 %v1544_v56 }
 0x703   : > { %v1305_v59 = vpop.f32.mrb[14].mxu0 }
 0x704   : > { %v2633_v60 = vpop.f32.mrb[15].mxu0  ;;  %v1546_v58 = vcvt.s32.f32 %v1545_v57 }
 0x706   : > { %vm1547_vm7 = vcmp.eq.f32.partialorder %v1546_v58, 0.0 }
 0x748   : > { %v1310_v61 = vpop.permute.xlu0 %1309 }
 0x749   : > { %v1320_v63 = vsel %vm866_vm2, %v969_v43, %v1310_v61 }
 0x76c   : > { %v1314_v62 = vpop.permute.xlu1 %1313 }
 0x76d   : > { %v1322_v1 = vsel %vm1321_vm5, %v1320_v63, %v1314_v62 }
 0x774   : > { %v1318_v2 = vpop.permute.xlu0 %1317 }
 0x775   : > { %v1324_v3 = vsel %vm1323_vm6, %v1322_v1, %v1318_v2 }
 0x776   : > { %v1325_v4 = vpack.c.bf16 %v1324_v3, %v1324_v3 }
 0x778   : > { %2639 = vmatmul.mubr.msk.bf16.vlgmr.msra.gmra.mrb[20].mxu1 %vm775_vm0, %v1325_v4 }
 0x779   : > { %2654 = vmatprep.mubr.msk.bf16.mxu1 %vm3327_vm1, %v3326_v8  ;;  %2651 = vmatpush3.bf16.msra.mxu1 %v2888_v14 }
 0x77a   : > { %2652 = vmatprep.subr.bf16.mxu1 %v3326_v8 }
 0x77d   : > { %2653 = vmatpush3.bf16.msra.mxu1 %v2889_v21 }
 0x77e   : > { %2664 = vmatprep.subr.bf16.mxu1 %v3326_v8 }
 0x780   : > { %2655 = vmatmul.mubr.msk.bf16.vlgmr.msra.gmra.mrb[24].mxu1 %vm775_vm0, %v1476_v23 }
 0x781   : > { %2666 = vmatprep.mubr.msk.bf16.mxu1 %vm3327_vm1, %v3326_v8 }
 0x84b   : > { %v1386_v6 = vpop.f32.mrb[20].mxu1 }
 0x84c   : > { %v1387_v7 = vadd.f32 %v2484_v5, %v1386_v6  ;;  %v2640_v9 = vpop.f32.mrb[21].mxu1 }
 0x84d   : > { %v1389_v10 = vpop.f32.mrb[22].mxu1 }
 0x84e   : > { %v3920_v11 = vadd.f32 %v1387_v7, %v3814_v0  ;;  %v2641_v12 = vpop.f32.mrb[23].mxu1 }
 0x850   : > { %v1393_v13 = vsel %vm775_vm0, %v3920_v11, 0.0 }
 0x851   : > { %1394 = vadd.xlane.f32.xlu1 %v1393_v13 }
 0x853   : > { %v1537_v31 = vpop.f32.mrb[24].mxu1 }
 0x854   : > { %v1538_v32 = vadd.f32 %v2492_v30, %v1537_v31  ;;  %v2656_v33 = vpop.f32.mrb[25].mxu1 }
 0x855   : > { %v1540_v34 = vpop.f32.mrb[26].mxu1 }
 0x856   : > { %v1541_v35 = vadd.f32 %v2492_v30, %v1540_v34  ;;  %v2657_v36 = vpop.f32.mrb[27].mxu1 }
 0x858   : > { %v3946_v37 = vpack.c.bf16 %v1541_v35, %v1538_v32 }
 0x85a   : > { %v1554_v38 = vsel %vm866_vm2, %v3946_v37, 0 }
 0x8de   : > { %v1395_v15 = vpop.xlane.xlu1 %1394 }
 0x8df   : > { %v1396_v16 = vmul.f32 0.03125, %v1395_v15 }
 0x8e1   : > { %v1397_v17 = vsub.f32 %v3920_v11, %v1396_v16 }
 0x8e3   : > { %v1398_v18 = vmul.f32 %v1397_v17, %v1397_v17 }
 0x8e5   : > { %v1399_v0 = vsel %vm775_vm0, %v1398_v18, 0.0 }
 0x8e6   : > { %1400 = vadd.xlane.f32.xlu0 %v1399_v0 }
 0x8fc   : > { %1659 = vrot.lane.b32.xlu0 %v3946_v37, %s3328_s0 }
 0x973   : > { %v1401_v26 = vpop.xlane.xlu0 %1400 }
 0x974   : > { %v1402_v22 = vmul.f32 0.032258064, %v1401_v26 }
 0x976   : > { %2918 = vrsqrt.f32 %v1402_v22 }
 0x977   : > { %v1660_v46 = vpop.permute.xlu0 %1659 }
 0x978   : > { %v1665_v48 = vsel %vm866_vm2, %v1660_v46, 0 }
 0x980   : > { %v2919_v27 = vpop.eup %2918 }
 0x981   : > { %v1404_v28 = vmul.f32 %v2919_v27, %v1397_v17 }
 0x983   : > { %v1405_v29 = vpack.c.bf16 %v1404_v28, %v1404_v28 }
 0x985   : > { %2647 = vmatmul.mubr.msk.bf16.vlgmr.msra.gmra.mrb[16].mxu0 %vm775_vm0, %v1405_v29 }
 0x986   : > { %2660 = vmatprep.mubr.msk.bf16.mxu0 %vm3327_vm1, %v3326_v8  ;;  %2659 = vmatpush3.bf16.xpose.msra.mxu0 %v1554_v38 }
 0x987   : > { %2670 = vmatprep.subr.bf16.mxu0 %v3326_v8 }
 0xa58   : > { %v1459_v39 = vpop.f32.mrb[16].mxu0 }
 0xa59   : > { %v1465_v41 = vmul.f32 1000000.0, %v1459_v39  ;;  %v2648_v42 = vpop.f32.mrb[17].mxu0 }
 0xa5a   : > { %v1462_v43 = vpop.f32.mrb[18].mxu0 }
 0xa5b   : > { %v1473_v44 = vadd.f32 %v2491_v40, %v1465_v41  ;;  %v2649_v45 = vpop.f32.mrb[19].mxu0 }
 0xa5d   : > { %v1548_v47 = vpack.c.bf16 %v1473_v44, %v1473_v44 }
 0xa5f   : > { %1657 = vrot.lane.b32.xlu1 %v1548_v47, %s3328_s0  ;;  %1766 = vrot.lane.b32.xlu0 %v1548_v47, %s3332_s4  ;;  %s4189_s0 = smov 24  }
 0xa60   : > { %2661 = vmatmul.mubr.msk.bf16.vlgmr.msra.gmra.mrb[20].mxu0 %vm866_vm2, %v1548_v47 }
 0xa61   : > { %2671 = vmatpush3.bf16.xpose.msra.mxu0 %v1665_v48  ;;  %2672 = vmatprep.mubr.msk.bf16.mxu0 %vm3327_vm1, %v3326_v8 }
 0xa62   : > { %2682 = vmatprep.subr.bf16.mxu0 %v3326_v8 }
 0xa63   : > { %1768 = vrot.lane.b32.xlu1 %v3946_v37, %s3332_s4  ;;  %1875 = vrot.lane.b32.xlu0 %v1548_v47, %s3334_s9 }
 0xa67   : > { %1877 = vrot.lane.b32.xlu1 %v3946_v37, %s3334_s9  ;;  %s4193_s9 = sld [smem:[#allocation42_spill]] }
 0xad1   : > { %v1658_v49 = vpop.permute.xlu1 %1657  ;;  %v1767_v53 = vpop.permute.xlu0 %1766 }
 0xad2   : > { %2673 = vmatmul.mubr.msk.bf16.vlgmr.msra.gmra.mrb[24].mxu0 %vm866_vm2, %v1658_v49 }
 0xad3   : > { %2684 = vmatprep.mubr.msk.bf16.mxu0 %vm3327_vm1, %v3326_v8 }
 0xad5   : > { %v1769_v50 = vpop.permute.xlu1 %1768  ;;  %v1876_v55 = vpop.permute.xlu0 %1875 }
 0xad6   : > { %v1774_v51 = vsel %vm866_vm2, %v1769_v50, 0 }
 0xad7   : > { %2683 = vmatpush3.bf16.xpose.msra.mxu0 %v1774_v51 }
 0xad8   : > { %2694 = vmatprep.subr.bf16.mxu0 %v3326_v8 }
 0xad9   : > { %v1878_v52 = vpop.permute.xlu1 %1877 }
 0xada   : > { %v1883_v54 = vsel %vm866_vm2, %v1878_v52, 0 }
 0xade   : > { %2685 = vmatmul.mubr.msk.bf16.vlgmr.msra.gmra.mrb[28].mxu0 %vm866_vm2, %v1767_v53 }
 0xadf   : > { %2695 = vmatpush3.bf16.xpose.msra.mxu0 %v1883_v54  ;;  %2696 = vmatprep.mubr.msk.bf16.mxu0 %vm3327_vm1, %v3326_v8 }
 0xae0   : > { %2706 = vmatprep.subr.bf16.mxu0 %v3326_v8 }
 0xae6   : > { %2697 = vmatmul.mubr.msk.bf16.vlgmr.msra.gmra.mrb[32].mxu0 %vm866_vm2, %v1876_v55 }
 0xae7   : > { %2710 = vmatprep.mubr.msk.bf16.mxu0 %vm3327_vm1, %v3326_v8 }
 0xb33   : > { %v1590_v59 = vpop.f32.mrb[20].mxu0 }
 0xb34   : > { %v1596_v60 = vsel %vm1547_vm7, -1e+09, %v1590_v59  ;;  %v2662_v61 = vpop.f32.mrb[21].mxu0 }
 0xb35   : > { %v1593_v62 = vpop.f32.mrb[22].mxu0  ;;  %v1597_v63 = vsel %vm1321_vm5, %v1596_v60, -inf }
 0xb36   : > { %1598 = vmax.xlane.f32.xlu1 %v1597_v63  ;;  %v2663_v1 = vpop.f32.mrb[23].mxu0 }
 0xba5   : > { %v1701_v2 = vpop.f32.mrb[24].mxu0 }
 0xba6   : > { %v1707_v3 = vsel %vm1547_vm7, -1e+09, %v1701_v2  ;;  %v2674_v4 = vpop.f32.mrb[25].mxu0 }
 0xba7   : > { %v1704_v5 = vpop.f32.mrb[26].mxu0  ;;  %v1708_v6 = vsel %vm1321_vm5, %v1707_v3, -inf }
 0xba8   : > { %1709 = vmax.xlane.f32.xlu0 %v1708_v6  ;;  %v2675_v7 = vpop.f32.mrb[27].mxu0  ;;  %v2892_v6 = vld [vmem:[#allocation16] sm:$0xff]  }
 0xba9   : > { %2707 = vmatpush3.bf16.msra.mxu0 %v2892_v6  ;;  %v2893_v7 = vld [vmem:[#allocation16 + $0x8] sm:$0xff]  }
 0xbaa   : > { %2708 = vmatprep.subr.bf16.mxu0 %v3326_v8 }
 0xbad   : > { %2709 = vmatpush3.bf16.msra.mxu0 %v2893_v7 }
 0xbae   : > { %2722 = vmatprep.subr.bf16.mxu0 %v3326_v8 }
 0xbb1   : > { %v1810_v9 = vpop.f32.mrb[28].mxu0 }
 0xbb2   : > { %v1816_v10 = vsel %vm1547_vm7, -1e+09, %v1810_v9  ;;  %v2686_v12 = vpop.f32.mrb[29].mxu0 }
 0xbb3   : > { %v1813_v13 = vpop.f32.mrb[30].mxu0  ;;  %v1817_v14 = vsel %vm1321_vm5, %v1816_v10, -inf }
 0xbb4   : > { %1818 = vmax.xlane.f32.xlu0 %v1817_v14  ;;  %v2687_v15 = vpop.f32.mrb[31].mxu0 }
 0xbb9   : > { %v1919_v16 = vpop.f32.mrb[32].mxu0 }
 0xbba   : > { %v1925_v17 = vsel %vm1547_vm7, -1e+09, %v1919_v16  ;;  %v2698_v18 = vpop.f32.mrb[33].mxu0 }
 0xbbb   : > { %v1922_v0 = vpop.f32.mrb[34].mxu0  ;;  %v1926_v19 = vsel %vm1321_vm5, %v1925_v17, -inf }
 0xbbc   : > { %1927 = vmax.xlane.f32.xlu1 %v1926_v19  ;;  %v2699_v20 = vpop.f32.mrb[35].mxu0 }
 0xbc3   : > { %v1599_v21 = vpop.xlane.xlu1 %1598 }
 0xbc4   : > { %v1600_v23 = vsub.f32 %v1596_v60, %v1599_v21 }
 0xbc6   : > { %v1601_v24 = vmul.f32 1.442695, %v1600_v23 }
 0xbc8   : > { %2920 = vpow2.f32 %v1601_v24 }
 0xbd2   : > { %v2921_v25 = vpop.eup %2920 }
 0xbd3   : > { %v1603_v26 = vsel %vm1321_vm5, %v2921_v25, 0.0 }
 0xbd4   : > { %1604 = vadd.xlane.f32.xlu0 %v1603_v26 }
 0xc35   : > { %v1710_v22 = vpop.xlane.xlu0 %1709 }
 0xc36   : > { %v1711_v27 = vsub.f32 %v1707_v3, %v1710_v22 }
 0xc38   : > { %v1712_v28 = vmul.f32 1.442695, %v1711_v27 }
 0xc3a   : > { %2922 = vpow2.f32 %v1712_v28 }
 0xc41   : > { %v1819_v29 = vpop.xlane.xlu0 %1818 }
 0xc42   : > { %v1820_v30 = vsub.f32 %v1816_v10, %v1819_v29 }
 0xc44   : > { %v2923_v31 = vpop.eup %2922  ;;  %v1821_v32 = vmul.f32 1.442695, %v1820_v30 }
 0xc45   : > { %v1714_v33 = vsel %vm1321_vm5, %v2923_v31, 0.0 }
 0xc46   : > { %2924 = vpow2.f32 %v1821_v32  ;;  %1715 = vadd.xlane.f32.xlu1 %v1714_v33 }
 0xc49   : > { %v1928_v36 = vpop.xlane.xlu1 %1927 }
 0xc4a   : > { %v1929_v38 = vsub.f32 %v1925_v17, %v1928_v36 }
 0xc4c   : > { %v1930_v39 = vmul.f32 1.442695, %v1929_v38 }
 0xc4e   : > { %2926 = vpow2.f32 %v1930_v39  ;;  %v2896_v39 = vld [vmem:[%s4191_s11] sm:$0xff]  }
 0xc50   : > { %v2925_v34 = vpop.eup %2924 }
 0xc51   : > { %v1823_v35 = vsel %vm1321_vm5, %v2925_v34, 0.0 }
 0xc52   : > { %1824 = vadd.xlane.f32.xlu0 %v1823_v35 }
 0xc57   : > { %1720 = vrot.lane.b32.xlu1 %v3946_v37, %s3330_s8  ;;  %s2468_s8 = sshll.u32 %s3769_s18, 3 }
 0xc58   : > { %v2927_v40 = vpop.eup %2926  ;;  %s763_s7 = scalar_lea.vmem [#allocation19], %s2468_s8 }
 0xc59   : > { %v1932_v41 = vsel %vm1321_vm5, %v2927_v40, 0.0  ;;  %s2249_s17 = sshll.u32 %s763_s7, 4  ;;  %s4065_s17 = int_to_ptr.vmem [resolvable:$true] %s2249_s17 }
 0xc61   : > { %v1605_v42 = vpop.xlane.xlu0 %1604 }
 0xc62   : > { %2928 = vrcp.f32 %v1605_v42 }
 0xc68   : > { %1610 = vrot.lane.b32.xlu0 %v3946_v37, %s3329_s21  ;;  %s4192_s21 = sld [smem:[#allocation40_spill]] }
 0xc6c   : > { %1938 = vrot.lane.b32.xlu0 %v3946_v37, %s3333_s20  ;;  %v2929_v44 = vpop.eup %2928 }
 0xc6d   : > { %v1607_v46 = vmul.f32 %v2929_v44, %v2921_v25  ;;  %v2504_v25 = vld [vmem:[#allocation17] ss:$0 sm:$0xff] }
 0xc6f   : > { %v1608_v48 = vpack.c.bf16 %v1607_v46, %v1607_v46  ;;  %v2898_v46 = vld [vmem:[%s4191_s11 + $0x10] sm:$0xff]  }
 0xc7b   : > { %1933 = vadd.xlane.f32.xlu1 %v1932_v41 }
 0xc8c   : > { %1829 = vrot.lane.b32.xlu1 %v3946_v37, %s3331_s25  ;;  %s4190_s25 = sld [smem:[#allocation39_spill]] }
 0xc92   : > { %v2894_v38 = vld [vmem:[%s4190_s25] sm:$0xff]  }
 0xcd3   : > { %v1716_v43 = vpop.xlane.xlu1 %1715 }
 0xcd4   : > { %2930 = vrcp.f32 %v1716_v43 }
 0xcd7   : > { %v1721_v50 = vpop.permute.xlu1 %1720 }
 0xcde   : > { %v2931_v49 = vpop.eup %2930 }
 0xcdf   : > { %v1825_v45 = vpop.xlane.xlu0 %1824  ;;  %v1718_v37 = vmul.f32 %v2931_v49, %v2923_v31  ;;  %v2511_v49 = vld [vmem:[%s4192_s21] ss:$0 sm:$0xff] }
 0xce0   : > { %2932 = vrcp.f32 %v1825_v45 }
 0xce1   : > { %v1719_v51 = vpack.c.bf16 %v1718_v37, %v1718_v37 }
 0xce3   : > { %v1611_v47 = vpop.permute.xlu0 %1610 }
 0xce4   : > { %2665 = vmatpush3.bf16.msra.mxu1 %v1611_v47  ;;  %v2899_v47 = vld [vmem:[%s4191_s11 + $0x18] sm:$0xff]  }
 0xce5   : > { %2676 = vmatprep.subr.bf16.mxu1 %v3326_v8 }
 0xce7   : > { %2667 = vmatmul.mubr.msk.bf16.vlgmr.msra.gmra.mrb[28].mxu1 %vm1321_vm5, %v1608_v48  ;;  %v1939_v57 = vpop.permute.xlu0 %1938 }
 0xce8   : > { %2677 = vmatpush3.bf16.msra.mxu1 %v1721_v50  ;;  %2678 = vmatprep.mubr.msk.bf16.mxu1 %vm3327_vm1, %v3326_v8 }
 0xce9   : > { %2688 = vmatprep.subr.bf16.mxu1 %v3326_v8 }
 0xcea   : > { %v2933_v52 = vpop.eup %2932 }
 0xceb   : > { %v1827_v54 = vmul.f32 %v2933_v52, %v2925_v34 }
 0xced   : > { %v1828_v56 = vpack.c.bf16 %v1827_v54, %v1827_v54 }
 0xcef   : > { %2679 = vmatmul.mubr.msk.bf16.vlgmr.msra.gmra.mrb[32].mxu1 %vm1321_vm5, %v1719_v51 }
 0xcf0   : > { %2690 = vmatprep.mubr.msk.bf16.mxu1 %vm3327_vm1, %v3326_v8 }
 0xd08   : > { %v1934_v53 = vpop.xlane.xlu1 %1933 }
 0xd09   : > { %2934 = vrcp.f32 %v1934_v53 }
 0xd0c   : > { %v1830_v55 = vpop.permute.xlu1 %1829 }
 0xd0d   : > { %2689 = vmatpush3.bf16.msra.mxu1 %v1830_v55 }
 0xd0e   : > { %2700 = vmatprep.subr.bf16.mxu1 %v3326_v8 }
 0xd10   : > { %2691 = vmatmul.mubr.msk.bf16.vlgmr.msra.gmra.mrb[36].mxu1 %vm1321_vm5, %v1828_v56 }
 0xd11   : > { %2701 = vmatpush3.bf16.msra.mxu1 %v1939_v57  ;;  %2702 = vmatprep.mubr.msk.bf16.mxu1 %vm3327_vm1, %v3326_v8 }
 0xd12   : > { %2714 = vmatprep.subr.bf16.mxu1 %v3326_v8 }
 0xd13   : > { %v2935_v58 = vpop.eup %2934 }
 0xd14   : > { %v1936_v59 = vmul.f32 %v2935_v58, %v2927_v40  ;;  %v2897_v40 = vld [vmem:[%s4191_s11 + $0x8] sm:$0xff]  }
 0xd16   : > { %v1937_v60 = vpack.c.bf16 %v1936_v59, %v1936_v59 }
 0xd18   : > { %2703 = vmatmul.mubr.msk.bf16.vlgmr.msra.gmra.mrb[40].mxu1 %vm1321_vm5, %v1937_v60 }
 0xd19   : > { %2718 = vmatprep.mubr.msk.bf16.mxu1 %vm3327_vm1, %v3326_v8  ;;  %2715 = vmatpush3.bf16.msra.mxu1 %v2894_v38 }
 0xd1a   : > { %2716 = vmatprep.subr.bf16.mxu1 %v3326_v8 }
 0xdba   : > { %v1650_v61 = vpop.f32.mrb[28].mxu1 }
 0xdbb   : > { %v2668_v62 = vpop.f32.mrb[29].mxu1 }
 0xdbc   : > { %v1653_v63 = vpop.f32.mrb[30].mxu1 }
 0xdbd   : > { %v2669_v1 = vpop.f32.mrb[31].mxu1 }
 0xdc2   : > { %v1760_v2 = vpop.f32.mrb[32].mxu1 }
 0xdc3   : > { %1985 = vrot.lane.b32.xlu1 %v1760_v2, %s4187_s5  ;;  %v2680_v3 = vpop.f32.mrb[33].mxu1  ;;  %s4063_s5 = scalar_lea.hbm %s4194_s6, %s2519_s10 }
 0xdc4   : > { %v1763_v4 = vpop.f32.mrb[34].mxu1 }
 0xdc5   : > { %v2681_v5 = vpop.f32.mrb[35].mxu1 }
 0xde3   : > { %v1869_v9 = vpop.f32.mrb[36].mxu1 }
 0xde4   : > { %1989 = vrot.lane.b32.xlu0 %v1869_v9, %s4188_s26  ;;  %v2692_v10 = vpop.f32.mrb[37].mxu1  ;;  %s3222_s26 = scalar_lea.vmem %s4065_s17, 128 }
 0xde5   : > { %v1872_v12 = vpop.f32.mrb[38].mxu1  ;;  %p3223_p7 = scmp.ne.s32.totalorder %s4065_s17, %s3222_s26 }
 0xde6   : > { %v2693_v13 = vpop.f32.mrb[39].mxu1 }
 0xde7   : > { %p3224_p6 = pnand %p3223_p7, %p4195_p0 }
 0xde9   : > { %p3225_p11 = pneg %p3224_p6 }
 0xdeb   : > { %v1978_v14 = vpop.f32.mrb[40].mxu1 }
 0xdec   : > { %1993 = vrot.lane.b32.xlu1 %v1978_v14, %s4189_s0  ;;  %v2704_v15 = vpop.f32.mrb[41].mxu1  ;;  %s3342_s0 = smov [#allocation19]  }
 0xded   : > { %v1981_v16 = vpop.f32.mrb[42].mxu1  ;;  %s3226_s21 = sshll.u32 %s3342_s0, 4  ;;  %s3227_s21 = int_to_ptr.vmem [resolvable:$false] %s3226_s21 }
 0xdee   : > { %v2705_v17 = vpop.f32.mrb[43].mxu1  ;;  %s3228_s8 = scalar_lea.vmem %s3227_s21, 256  ;;  %p3229_p8 = scmp.lt.s32.totalorder %s4065_s17, %s3227_s21 }
 0xdef   : > { %p3230_p9 = scmp.lt.s32.totalorder %s3228_s8, %s3222_s26 }
 0xdf1   : > { %p3231_p12 = por %p3230_p9, %p3229_p8 }
 0xdf3   : > { %p3232_p13 = pnand %p3231_p12, %p3225_p11 }
 0xe35   : > { %v1986_v18 = vpop.permute.xlu1 %1985 }
 0xe36   : > { %v1996_v19 = vsel %vm866_vm2, %v1650_v61, %v1986_v18 }
 0xe56   : > { %v1990_v0 = vpop.permute.xlu0 %1989 }
 0xe57   : > { %v1997_v20 = vsel %vm1321_vm5, %v1996_v19, %v1990_v0 }
 0xe5e   : > { %v1994_v21 = vpop.permute.xlu1 %1993 }
 0xe5f   : > { %v1998_v23 = vsel %vm1323_vm6, %v1997_v20, %v1994_v21 }
 0xe60   : > { %v1999_v24 = vpack.c.bf16 %v1998_v23, %v1998_v23 }
 0xe62   : > { %2711 = vmatmul.mubr.msk.bf16.vlgmr.msra.gmra.mrb[36].mxu0 %vm775_vm0, %v1999_v24 }
 0xe63   : > { %2730 = vmatprep.mubr.msk.bf16.mxu0 %vm3327_vm1, %v3326_v8  ;;  %2723 = vmatpush3.bf16.msra.mxu0 %v2896_v39 }
 0xe64   : > { %2724 = vmatprep.subr.bf16.mxu0 %v3326_v8 }
 0xe67   : > { %2725 = vmatpush3.bf16.msra.mxu0 %v2897_v40 }
 0xe68   : > { %2726 = vmatprep.subr.bf16.mxu0 %v3326_v8 }
 0xe6b   : > { %2727 = vmatpush3.bf16.msra.mxu0 %v2898_v46 }
 0xe6c   : > { %2728 = vmatprep.subr.bf16.mxu0 %v3326_v8  ;;  %v2512_v8 = vld [vmem:[%s4193_s9] ss:$0 sm:$0xff] }
 0xe6f   : > { %2729 = vmatpush3.bf16.msra.mxu0 %v2899_v47 }
 0xf35   : > { %v2060_v26 = vpop.f32.mrb[36].mxu0 }
 0xf36   : > { %v2061_v22 = vadd.f32 %v2504_v25, %v2060_v26  ;;  %v2712_v27 = vpop.f32.mrb[37].mxu0 }
 0xf37   : > { %v2063_v28 = vpop.f32.mrb[38].mxu0 }
 0xf38   : > { %v2066_v29 = vadd.f32 %v2061_v22, %v3920_v11  ;;  %v2713_v30 = vpop.f32.mrb[39].mxu0  ;;  %v2895_v11 = vld [vmem:[%s4190_s25 + $0x8] sm:$0xff]  }
 0xf39   : > { %2717 = vmatpush3.bf16.msra.mxu1 %v2895_v11 }
 0xf3a   : > { %v2067_v31 = vsel %vm775_vm0, %v2066_v29, 0.0 }
 0xf3b   : > { %2068 = vadd.xlane.f32.xlu0 %v2067_v31 }
 0xfc8   : > { %v2069_v32 = vpop.xlane.xlu0 %2068 }
 0xfc9   : > { %v2070_v33 = vmul.f32 0.03125, %v2069_v32 }
 0xfcb   : > { %v2071_v34 = vsub.f32 %v2066_v29, %v2070_v33 }
 0xfcd   : > { %v2072_v35 = vmul.f32 %v2071_v34, %v2071_v34 }
 0xfcf   : > { %v2073_v36 = vsel %vm775_vm0, %v2072_v35, 0.0 }
 0xfd0   : > { %2074 = vadd.xlane.f32.xlu1 %v2073_v36 }
0x105d   : > { %v2075_v41 = vpop.xlane.xlu1 %2074 }
0x105e   : > { %v2076_v42 = vmul.f32 0.032258064, %v2075_v41 }
0x1060   : > { %2936 = vrsqrt.f32 %v2076_v42 }
0x106a   : > { %v2937_v43 = vpop.eup %2936 }
0x106b   : > { %v2078_v44 = vmul.f32 %v2937_v43, %v2071_v34 }
0x106d   : > { %v2079_v45 = vpack.c.bf16 %v2078_v44, %v2078_v44 }
0x106f   : > { %2719 = vmatmul.mubr.msk.bf16.vlgmr.msra.gmra.mrb[44].mxu1 %vm775_vm0, %v2079_v45 }
0x1142   : > { %v2133_v48 = vpop.f32.mrb[44].mxu1 }
0x1143   : > { %v2139_v50 = vmul.f32 1000000.0, %v2133_v48  ;;  %v2720_v37 = vpop.f32.mrb[45].mxu1 }
0x1144   : > { %v2136_v51 = vpop.f32.mrb[46].mxu1 }
0x1145   : > { %v2147_v52 = vadd.f32 %v2511_v49, %v2139_v50  ;;  %v2721_v53 = vpop.f32.mrb[47].mxu1 }
0x1147   : > { %v2148_v54 = vmax.f32 %v2147_v52, 0.0 }
0x1149   : > { %v2149_v55 = vpack.c.bf16 %v2148_v54, %v2148_v54 }
0x114b   : > { %2731 = vmatmul.mubr.msk.bf16.vlgmr.msra.gmra.mrb[40].mxu0 %vm2189_vm8, %v2149_v55 }
0x121e   : > { %v2227_v56 = vpop.f32.mrb[40].mxu0 }
0x121f   : > { %v2228_v57 = vadd.f32 %v2512_v8, %v2227_v56  ;;  %v2732_v58 = vpop.f32.mrb[41].mxu0 }
0x1220   : > { %v2230_v59 = vpop.f32.mrb[42].mxu0 }
0x1221   : > { %v2233_v60 = vadd.f32 %v2228_v57, %v2066_v29  ;;  %v2733_v61 = vpop.f32.mrb[43].mxu0 }
0x1223   : > { %2234 = vst.msk [vmem:[%s763_s7] sm:$0xff] %vm775_vm0, %v2233_v60 }
0x1224   : > { %3235 = shalt.err (!%p3232_p13)
}
0x1225   : > { %s3236_s18 = scalar_lea.hbm %s4063_s5, 128  ;;  %s3240_s9 = scalar_lea.hbm %s4194_s6, 256 }
0x1226   : > { %p3237_p1 = scmp.ne.s32.totalorder %s4063_s5, %s3236_s18  ;;  %p3241_p4 = scmp.lt.u32.totalorder %s4063_s5, %s4194_s6 }
0x1227   : > { %p3242_p10 = scmp.lt.u32.totalorder %s3240_s9, %s3236_s18  ;;  %p3244_p7 = scmp.lt.u32.totalorder %s3236_s18, %s4063_s5 }
0x1228   : > { %p3238_p3 = pnand %p3237_p1, %p4195_p0 }
0x1229   : > { %p3243_p5 = por %p3242_p10, %p3241_p4 }
0x122a   : > { %p3239_p2 = pneg %p3238_p3 }
0x122b   : > { %p3245_p6 = por %p3244_p7, %p3243_p5 }
0x122d   : > { %p3246_p11 = pnand %p3245_p6, %p3239_p2 }
0x122f   : > { %3249 = shalt.err (!%p3246_p11)
}
0x1230   : > { %2770 = dma.vmem_to_hbm [thread:$0]  (%p4195_p0), %s4065_s17, 128, %s4063_s5, %s2236_s1  }
0x1231 PF: > { %s2261_s14 = sand.u32 1, %s3300_s27   ;;  %p4196_p8 = scmp.ne.s32.totalorder %s4168_s19, 0 }
0x1232   : > { %p4197_p9 = scmp.ge.s32.totalorder %s3312_s30, 2  ;;  %s2262_s24 = scalar_lea.sflag [#allocation4], %s2261_s14 }
0x1234   : > { %p2805_p12 = pnand %p4197_p9, %p4196_p8 }
0x1236   : > { %3295 = dma.done.wait (!%p2805_p12), %s2262_s24, 128  }
0x1237   : > { %3297 = vsyncadd (!%p2805_p12), %s2262_s24, 4294967168  ;;  %p38_p13 = scmp.ge.s32.totalorder %s3662_s2, 4   ;;  %s4198_s27 = smov %s3304_s28 }
0x1238   : > { %s4199_s28 = smov %s3308_s29  ;;  %s4200_s29 = smov %s3673_s16 }
0x1239   : > { %s4201_s30 = smov %s3662_s2  ;;  %40 = sbr.rel (!%p38_p13) target bundleno = 28 (0x1c), region = 188 }
0x1240   :  { %2267 = vsyncpa [#allocation3], 1 }
0x1241   :  { %2269 = vsyncpa [#allocation3 + $0x1], 1 }
0x1242   :  { %2270 = vsyncpa [#allocation6], 1 }
0x1243   :  { %2272 = vsyncpa [#allocation6 + $0x1], 1 }
0x1244   :  { %2273 = vsyncpa [#allocation9], 1 }
0x1245   :  { %2274 = vsyncpa [#allocation12], 1 }
0x1246   :  { %2275 = vsyncpa [#allocation15], 1 }
0x1247   :  { %2276 = vsyncpa [#allocation18], 1 }
0x1248   :  { %2277 = vsyncpa [#allocation4], 1 }
0x1249   :  { %2279 = vsyncpa [#allocation4 + $0x1], 1 }

</bundles_post_ra>
